<compile_context>
chip_gen: v6e
topology: v6e:2x2x1
jax: 0.10.0
libtpu: 0.0.40
codegen_flags: <defaults>
</compile_context>

<pallas_src>
import functools

import jax
import jax.numpy as jnp
from jax import lax
from jax.experimental import pallas as pl
from jax.experimental.pallas import tpu as pltpu

NEG_SLOPE = 0.01  # torch.nn.LeakyReLU default negative_slope


# ------------------------------ helpers --------------------------------------

def _pick_tile(total, cap, unit=8):
    """Largest divisor of `total` that is <= cap and a multiple of `unit`.

    Falls back to `total` itself (a full-extent block always satisfies the
    TPU (8, 128) block rule)."""
    if total <= cap:
        return total
    best = 0
    for d in range(unit, cap + 1, unit):
        if total % d == 0:
            best = d
    return best if best else total


def _vmem_budget_bytes():
    """Hardware-aware VMEM budget (v7x: 64 MiB phys -> ~38 MiB; v5e/v6e: ~77 MiB)."""
    cap = 64 * 1024 * 1024  # conservative default (v7x physical VMEM)
    try:
        cap = int(pltpu.get_tpu_info().vmem_capacity_bytes)
    except Exception:
        pass
    return int(min(cap * 0.6, 100 * 1024 * 1024))


# ----------------------------- Pallas kernels ---------------------------------

def _knn_kernel(q_ref, k_ref, idx_ref, *, k):
    """Fused pairwise inner product + online top-k.

    q_ref: (1, tq, C) bf16 query rows; k_ref: (1, HW, C) bf16 key slab;
    idx_ref: (1, tq, k) int32 nearest-neighbour indices (largest r == smallest
    Euclidean distance for L2-normalized rows; self is included, like torch)."""
    q = q_ref[0]
    kt = k_ref[0]
    r = lax.dot_general(q, kt, (((1,), (1,)), ((), ())),
                        preferred_element_type=jnp.float32)        # (tq, HW) f32
    tq, hw = r.shape
    col = lax.broadcasted_iota(jnp.int32, (tq, hw), 1).astype(jnp.float32)
    sentinel = jnp.float32(hw)
    parts = []
    for _ in range(k):                       # k is small & static -> unrolled
        m = jnp.max(r, axis=-1, keepdims=True)                     # (tq, 1)
        hit = r >= m
        first = jnp.min(jnp.where(hit, col, sentinel),
                        axis=-1, keepdims=True)                    # first argmax
        parts.append(first.astype(jnp.int32))
        r = jnp.where(col == first, -jnp.inf, r)                   # mask winner
    idx_ref[0] = jnp.concatenate(parts, axis=-1)                   # (tq, k)


def _nbr_mlp_sum_kernel(nb_ref, w_ref, b_ref, o_ref):
    """Fused neighbour MLP + LeakyReLU + sum over (k, HW).

    nb_ref: (tq*k, 2C) gathered [rgb_nb | ir_nb] rows for tq query rows of one
    batch item.  w_ref: (2C, 2C) concat-folded stacked weight, b_ref: (1, 2C).
    o_ref: (1, 1, 2C) per-batch accumulator, resident across the HW axis.  The
    1/(k*HW) mean scale is folded into the SE first-layer weight downstream."""
    t = pl.program_id(1)

    @pl.when(t == 0)
    def _():
        o_ref[...] = jnp.zeros_like(o_ref)

    z = nb_ref[...]
    y = jnp.dot(z, w_ref[...], preferred_element_type=jnp.float32) + b_ref[...]
    y = jnp.where(y >= 0, y, NEG_SLOPE * y)
    # cross-row reduction on the MXU (ones-row matmul) instead of an XLU reduce
    ones = jnp.ones((1, z.shape[0]), jnp.float32)
    o_ref[0] += jnp.dot(ones, y, preferred_element_type=jnp.float32)


def _se_combine_kernel(emit_hidden, cm_ref, w1_ref, b1_ref, w2_ref, b2_ref,
                       hr_ref, hi_ref, g1_ref, g2_ref, *rest):
    """Fused SE MLP (Linear->LeakyReLU->Linear->Sigmoid) + gating + combine.

    The gate s is computed once per batch item (t == 0) into a VMEM scratch;
    the remaining grid steps only stream h_rgb/h_ir through the gating.
    emit_hidden=True  -> outputs (h_rgb_new, h_ir_new)      (non-final iter)
    emit_hidden=False -> outputs relu(g1*h_rgb_new + g2*h_ir_new) (final)."""
    s_ref = rest[-1]
    out_refs = rest[:-1]
    t = pl.program_id(1)

    @pl.when(t == 0)
    def _():
        hid = jnp.dot(cm_ref[0], w1_ref[...],
                      preferred_element_type=jnp.float32) + b1_ref[...]
        hid = jnp.where(hid >= 0, hid, NEG_SLOPE * hid)
        s_ref[...] = jax.nn.sigmoid(
            jnp.dot(hid, w2_ref[...], preferred_element_type=jnp.float32)
            + b2_ref[...])                                          # (1, Cp)

    s = s_ref[...]
    a = s * hr_ref[0]                                               # (tq, Cp)
    b = (1.0 - s) * hi_ref[0]

    if emit_hidden:
        out_refs[0][0] = a
        out_refs[1][0] = b
    else:
        g1 = g1_ref[0, 0]
        g2 = g2_ref[0, 0]
        out_refs[0][0] = jnp.maximum(g1 * a + g2 * b, 0.0)          # fused ReLU


# ----------------------------- kernel wrappers --------------------------------

def knn_indices(x_norm, k, *, vmem_budget):
    """(N, HW, C) L2-normalized -> (N, HW, k) int32 nearest-neighbour indices."""
    n, hw, c = x_norm.shape
    xb = x_norm.astype(jnp.bfloat16)       # bf16 MXU pass; k-NN is tie-robust
    key_bytes = 2 * hw * c * 2             # double-buffered bf16 key slab
    per_row = hw * 4 + 2 * (c * 2 + k * 4) + 64
    avail = max(vmem_budget // 2 - key_bytes, per_row * 8)
    tq = _pick_tile(hw, int(min(max(avail // per_row, 8), 1024)))
    kernel = functools.partial(_knn_kernel, k=k)
    return pl.pallas_call(
        kernel,
        out_shape=jax.ShapeDtypeStruct((n, hw, k), jnp.int32),
        grid=(n, hw // tq),
        in_specs=[pl.BlockSpec((1, tq, c), lambda b, t: (b, t, 0)),
                  pl.BlockSpec((1, hw, c), lambda b, t: (b, 0, 0))],
        out_specs=pl.BlockSpec((1, tq, k), lambda b, t: (b, t, 0)),
        compiler_params=pltpu.CompilerParams(
            dimension_semantics=("parallel", "parallel"),
            vmem_limit_bytes=vmem_budget),
    )(xb, xb)


def neighbor_mlp_sum(nb, w_big, bias, n, hw, k, *, vmem_budget):
    """Gathered neighbours (N*HW*k, 2C) -> per-batch SE input sum (N, 1, 2C)."""
    c2 = w_big.shape[1]
    bytes_per_row = c2 * 4
    cap_rows = max(8, (vmem_budget // 6) // bytes_per_row)
    tq_cap = max(8, cap_rows // max(k, 1))
    tq = _pick_tile(hw, min(tq_cap, 2048))
    steps = hw // tq
    full2 = lambda b, t: (0, 0)
    # TODO(synk): pipeline_mode=pl.Buffered(3) on nb_spec would hide the gather
    # DMA better; omitted for compatibility with older BlockSpec signatures.
    nb_spec = pl.BlockSpec((tq * k, c2), lambda b, t: (b * steps + t, 0))
    return pl.pallas_call(
        _nbr_mlp_sum_kernel,
        out_shape=jax.ShapeDtypeStruct((n, 1, c2), jnp.float32),
        grid=(n, steps),
        in_specs=[nb_spec,
                  pl.BlockSpec(w_big.shape, full2),
                  pl.BlockSpec(bias.shape, full2)],
        out_specs=pl.BlockSpec((1, 1, c2), lambda b, t: (b, 0, 0)),
        compiler_params=pltpu.CompilerParams(
            dimension_semantics=("parallel", "arbitrary"),
            vmem_limit_bytes=vmem_budget),
    )(nb, w_big, bias)


def se_combine(cm, w1, b1, w2, b2, h_rgb, h_ir, g1, g2, *, emit_hidden,
               vmem_budget):
    """Fused SE + gating (+ gamma combine + ReLU when emit_hidden=False)."""
    n, hw, c = h_rgb.shape

    # Lane-dense packing: fold p = 128 // C spatial rows into 128 lanes.
    p = 1
    if c < 128 and 128 % c == 0 and hw % (128 // c) == 0:
        p = 128 // c
    hwp, cp = hw // p, c * p
    hr = h_rgb.reshape(n, hwp, cp)
    hi = h_ir.reshape(n, hwp, cp)
    w2p = jnp.tile(w2, (1, p)) if p > 1 else w2      # gate comes out pre-packed
    b2p = jnp.tile(b2, (1, p)) if p > 1 else b2

    n_out = 2 if emit_hidden else 1
    streams = 2 + n_out
    cap_rows = max(8, (vmem_budget // (2 * streams)) // (cp * 4))
    tq = _pick_tile(hwp, min(cap_rows, 2048))

    kernel = functools.partial(_se_combine_kernel, emit_hidden)
    big3 = lambda b, t: (b, t, 0)
    full2 = lambda b, t: (0, 0)
    scl = pl.BlockSpec((1, 1), full2, memory_space=pltpu.MemorySpace.SMEM)

    if emit_hidden:
        out_shape = (jax.ShapeDtypeStruct((n, hwp, cp), jnp.float32),
                     jax.ShapeDtypeStruct((n, hwp, cp), jnp.float32))
        out_specs = (pl.BlockSpec((1, tq, cp), big3),
                     pl.BlockSpec((1, tq, cp), big3))
    else:
        out_shape = jax.ShapeDtypeStruct((n, hwp, cp), jnp.float32)
        out_specs = pl.BlockSpec((1, tq, cp), big3)

    outs = pl.pallas_call(
        kernel,
        out_shape=out_shape,
        grid=(n, hwp // tq),
        in_specs=[pl.BlockSpec((1, 1, cm.shape[-1]), lambda b, t: (b, 0, 0)),
                  pl.BlockSpec(w1.shape, full2),
                  pl.BlockSpec(b1.shape, full2),
                  pl.BlockSpec(w2p.shape, full2),
                  pl.BlockSpec(b2p.shape, full2),
                  pl.BlockSpec((1, tq, cp), big3),
                  pl.BlockSpec((1, tq, cp), big3),
                  scl, scl],
        out_specs=out_specs,
        scratch_shapes=[pltpu.VMEM((1, cp), jnp.float32)],
        compiler_params=pltpu.CompilerParams(
            dimension_semantics=("parallel", "arbitrary"),
            vmem_limit_bytes=vmem_budget),
    )(cm, w1, b1, w2p, b2p, hr, hi, g1, g2)

    if emit_hidden:
        return outs[0].reshape(n, hw, c), outs[1].reshape(n, hw, c)
    return outs.reshape(n, hw, c)


# -------------------------------- JAX glue ------------------------------------

def max_pool_2x2_ceil(x):
    # F.max_pool2d(kernel=2, stride=2, ceil_mode=True) on NCHW.
    n, c, h, w = x.shape
    hp, wp = -(-h // 2) * 2, -(-w // 2) * 2
    if (hp, wp) != (h, w):
        x = jnp.pad(x, ((0, 0), (0, 0), (0, hp - h), (0, wp - w)),
                    constant_values=-jnp.inf)
    return x.reshape(n, c, hp // 2, 2, wp // 2, 2).max(axis=(3, 5))


def l2_normalize(x, eps=1e-12):
    # F.normalize(x, dim=-1)
    norm = jnp.sqrt(jnp.sum(x * x, axis=-1, keepdims=True))
    return x / jnp.maximum(norm, eps)


# ------------------------------ EnetGnn forward --------------------------------

def init_params(key, channels):
    keys = jax.random.split(key, 8)

    def linear(kw, kb, fan_in, fan_out):
        bound = 1.0 / (float(fan_in) ** 0.5)
        w = jax.random.uniform(kw, (fan_in, fan_out), jnp.float32, -bound, bound)
        b = jax.random.uniform(kb, (1, fan_out), jnp.float32, -bound, bound)
        return w, b

    c = channels
    r = c // 16
    p = {}
    p["rgb_g_w"], p["rgb_g_b"] = linear(keys[0], keys[1], 2 * c, c)
    p["ir_g_w"], p["ir_g_b"] = linear(keys[2], keys[3], 2 * c, c)
    p["se_rgb_w1"], p["se_rgb_b1"] = linear(keys[4], keys[5], 2 * c, r)
    p["se_rgb_w2"], p["se_rgb_b2"] = linear(keys[6], keys[7], r, c)
    # Note: se_ir and out_conv exist in the PyTorch __init__ but are never
    # used in forward(), so they are omitted here.
    p["gamma1"] = jnp.ones((1, 1), jnp.float32)
    p["gamma2"] = jnp.ones((1, 1), jnp.float32)
    return p


@functools.partial(jax.jit, static_argnames=("gnn_iterations", "k"))
def enet_gnn_forward(params, rgb, ir, gnn_iterations, k):
    rgb_p = max_pool_2x2_ceil(rgb)
    ir_p = max_pool_2x2_ceil(ir)
    n, c, hp, wp = rgb_p.shape
    hw = hp * wp
    budget = _vmem_budget_bytes()

    rgb_f = jnp.transpose(rgb_p.reshape(n, c, hw), (0, 2, 1))     # (N, HW, C)
    ir_f = jnp.transpose(ir_p.reshape(n, c, hw), (0, 2, 1))

    # Fused bf16 pairwise matmul + online top-k (no (N,HW,HW) HBM round trip).
    # NB: exactly like the PyTorch code, the indices are in [0, HW) but index
    # the flattened (N*HW, C) tensor (every batch item gathers batch 0's rows).
    rgb_knn = knn_indices(l2_normalize(rgb_f), k, vmem_budget=budget).reshape(-1)
    ir_knn = knn_indices(l2_normalize(ir_f), k, vmem_budget=budget).reshape(-1)

    h_rgb = rgb_f.reshape(n * hw, c)
    h_ir = ir_f.reshape(n * hw, c)

    # Fold the [a, a - b] concat into the weights once:
    #   [a, a-b] @ W == a @ (W_top + W_bot) - b @ W_bot
    # and stack both modalities into a single (2C, 2C) weight so the neighbour
    # MLP is one MXU matmul with contraction depth 2C.
    wr, wi = params["rgb_g_w"], params["ir_g_w"]                   # (2C, C)
    wa = jnp.concatenate([wr[:c] + wr[c:], -wi[c:]], axis=1)       # (C, 2C)
    wb = jnp.concatenate([-wr[c:], wi[:c] + wi[c:]], axis=1)       # (C, 2C)
    w_big = jnp.concatenate([wa, wb], axis=0)                      # (2C, 2C)
    bias = jnp.concatenate([params["rgb_g_b"], params["ir_g_b"]], axis=1)

    # Fold the 1/(k*HW) mean into the SE first-layer WEIGHT only (bias applies
    # after the mean-scaled input, so b1 is untouched).
    w1_scaled = params["se_rgb_w1"] * (1.0 / float(k * hw))
    b1 = params["se_rgb_b1"]
    w2, b2 = params["se_rgb_w2"], params["se_rgb_b2"]
    g1, g2 = params["gamma1"], params["gamma2"]

    h = None
    for it in range(gnn_iterations):
        # TODO(synk): the original PyTorch code raises for gnn_iterations > 1
        # (index_select on a 3-D tensor); here h_rgb/h_ir are re-flattened each
        # iteration, which matches the intended semantics (exact for 1 iter).
        # TODO(synk): the neighbour gather stays in XLA (jnp.take); an in-kernel
        # scalar-prefetch / pl.Element row gather would be one row per grid
        # step and a per-row DMA gather is too fine-grained, so it is left undone.
        rgb_nb = jnp.take(h_rgb, rgb_knn, axis=0)                  # (N*HW*k, C)
        ir_nb = jnp.take(h_ir, ir_knn, axis=0)
        nb = jnp.concatenate([rgb_nb, ir_nb], axis=1)              # (N*HW*k, 2C)

        # Fused MLP + LeakyReLU + sum over k and HW -> SE input (N, 1, 2C).
        cm_sum = neighbor_mlp_sum(nb, w_big, bias, n, hw, k, vmem_budget=budget)

        last = it == gnn_iterations - 1
        if last:
            h = se_combine(cm_sum, w1_scaled, b1, w2, b2,
                           h_rgb.reshape(n, hw, c), h_ir.reshape(n, hw, c),
                           g1, g2, emit_hidden=False,
                           vmem_budget=budget)                     # relu fused
        else:
            h_rgb3, h_ir3 = se_combine(
                cm_sum, w1_scaled, b1, w2, b2,
                h_rgb.reshape(n, hw, c), h_ir.reshape(n, hw, c),
                g1, g2, emit_hidden=True, vmem_budget=budget)
            h_rgb = h_rgb3.reshape(n * hw, c)
            h_ir = h_ir3.reshape(n * hw, c)

    out = jnp.transpose(h.reshape(n, hp, wp, c), (0, 3, 1, 2))     # (N, C, H, W)
    return out


# ---------------------------------- main ---------------------------------------

if __name__ == "__main__":
    key = jax.random.PRNGKey(0)
    k_rgb, k_ir, k_params = jax.random.split(key, 3)

    N, C, H, W = 2, 32, 16, 16           # channels must be >= 16 (C // 16 SE)
    GNN_ITERS, K = 1, 4

    rgb = jax.random.normal(k_rgb, (N, C, H, W), jnp.float32)
    ir = jax.random.normal(k_ir, (N, C, H, W), jnp.float32)
    params = init_params(k_params, C)

    out = enet_gnn_forward(params, rgb, ir, gnn_iterations=GNN_ITERS, k=K)
    out = jax.block_until_ready(out)

    assert out.shape == (N, C, H // 2, W // 2), out.shape
    assert bool(jnp.all(jnp.isfinite(out)))
    print("KERNEL_OK")
</pallas_src>

<mosaic_0001>
module attributes {stable_mosaic.version = 11 : i64} {
  func.func @_knn_kernel(%arg0: i32, %arg1: i32, %arg2: memref<1x64x32xbf16, #tpu.memory_space<vmem>>, %arg3: memref<1x64x32xbf16, #tpu.memory_space<vmem>>, %arg4: memref<1x64x4xi32, #tpu.memory_space<vmem>>) attributes {dimension_semantics = [#tpu.dimension_semantics<parallel>, #tpu.dimension_semantics<parallel>], iteration_bounds = array<i64: 2, 1>, scalar_prefetch = 0 : i64, scratch_operands = 0 : i64, tpu.core_type = #tpu.core_type<tc>, window_params = [{transform_indices = @transform_0, window_bounds = array<i64: 1, 64, 32>}, {transform_indices = @transform_1, window_bounds = array<i64: 1, 64, 32>}, {transform_indices = @transform_2, window_bounds = array<i64: 1, 64, 4>}]} {
    %c0 = arith.constant 0 : index
    %c0_0 = arith.constant 0 : index
    %c0_1 = arith.constant 0 : index
    %0 = vector.load %arg2[%c0, %c0_0, %c0_1] : memref<1x64x32xbf16, #tpu.memory_space<vmem>>, vector<1x64x32xbf16>
    %1 = vector.shape_cast %0 : vector<1x64x32xbf16> to vector<64x32xbf16>
    %c0_2 = arith.constant 0 : index
    %c0_3 = arith.constant 0 : index
    %c0_4 = arith.constant 0 : index
    %2 = vector.load %arg3[%c0_2, %c0_3, %c0_4] : memref<1x64x32xbf16, #tpu.memory_space<vmem>>, vector<1x64x32xbf16>
    %3 = vector.shape_cast %2 : vector<1x64x32xbf16> to vector<64x32xbf16>
    %cst = arith.constant dense<0.000000e+00> : vector<64x64xf32>
    %4 = tpu.matmul %1, %3, %cst {dimension_numbers = #tpu.dot_dimension_numbers<[1], [1], [0], [0], [0, 0, 1, 0], [], []>} : vector<64x32xbf16>, vector<64x32xbf16>, vector<64x64xf32> -> vector<64x64xf32>
    %5 = tpu.iota {dimensions = array<i32: 1>} : vector<64x64xi32>
    %6 = arith.sitofp %5 : vector<64x64xi32> to vector<64x64xf32>
    %cst_5 = arith.constant dense<0xFF800000> : vector<64xf32>
    %7 = vector.multi_reduction <maximumf>, %4, %cst_5 [1] : vector<64x64xf32> to vector<64xf32>
    %8 = vector.shape_cast %7 : vector<64xf32> to vector<64x1xf32>
    %9 = vector.broadcast %8 : vector<64x1xf32> to vector<64x64xf32>
    %10 = arith.cmpf oge, %4, %9 : vector<64x64xf32>
    %cst_6 = arith.constant 6.400000e+01 : f32
    %11 = vector.broadcast %cst_6 : f32 to vector<64x64xf32>
    %12 = arith.select %10, %6, %11 : vector<64x64xi1>, vector<64x64xf32>
    %cst_7 = arith.constant dense<0x7F800000> : vector<64xf32>
    %13 = vector.multi_reduction <minimumf>, %12, %cst_7 [1] : vector<64x64xf32> to vector<64xf32>
    %14 = vector.shape_cast %13 : vector<64xf32> to vector<64x1xf32>
    %15 = arith.fptosi %14 : vector<64x1xf32> to vector<64x1xi32>
    %16 = vector.broadcast %14 : vector<64x1xf32> to vector<64x64xf32>
    %17 = arith.cmpf oeq, %6, %16 : vector<64x64xf32>
    %cst_8 = arith.constant 0xFF800000 : f32
    %18 = vector.broadcast %cst_8 : f32 to vector<64x64xf32>
    %19 = arith.select %17, %18, %4 : vector<64x64xi1>, vector<64x64xf32>
    %cst_9 = arith.constant dense<0xFF800000> : vector<64xf32>
    %20 = vector.multi_reduction <maximumf>, %19, %cst_9 [1] : vector<64x64xf32> to vector<64xf32>
    %21 = vector.shape_cast %20 : vector<64xf32> to vector<64x1xf32>
    %22 = vector.broadcast %21 : vector<64x1xf32> to vector<64x64xf32>
    %23 = arith.cmpf oge, %19, %22 : vector<64x64xf32>
    %cst_10 = arith.constant 6.400000e+01 : f32
    %24 = vector.broadcast %cst_10 : f32 to vector<64x64xf32>
    %25 = arith.select %23, %6, %24 : vector<64x64xi1>, vector<64x64xf32>
    %cst_11 = arith.constant dense<0x7F800000> : vector<64xf32>
    %26 = vector.multi_reduction <minimumf>, %25, %cst_11 [1] : vector<64x64xf32> to vector<64xf32>
    %27 = vector.shape_cast %26 : vector<64xf32> to vector<64x1xf32>
    %28 = arith.fptosi %27 : vector<64x1xf32> to vector<64x1xi32>
    %29 = vector.broadcast %27 : vector<64x1xf32> to vector<64x64xf32>
    %30 = arith.cmpf oeq, %6, %29 : vector<64x64xf32>
    %cst_12 = arith.constant 0xFF800000 : f32
    %31 = vector.broadcast %cst_12 : f32 to vector<64x64xf32>
    %32 = arith.select %30, %31, %19 : vector<64x64xi1>, vector<64x64xf32>
    %cst_13 = arith.constant dense<0xFF800000> : vector<64xf32>
    %33 = vector.multi_reduction <maximumf>, %32, %cst_13 [1] : vector<64x64xf32> to vector<64xf32>
    %34 = vector.shape_cast %33 : vector<64xf32> to vector<64x1xf32>
    %35 = vector.broadcast %34 : vector<64x1xf32> to vector<64x64xf32>
    %36 = arith.cmpf oge, %32, %35 : vector<64x64xf32>
    %cst_14 = arith.constant 6.400000e+01 : f32
    %37 = vector.broadcast %cst_14 : f32 to vector<64x64xf32>
    %38 = arith.select %36, %6, %37 : vector<64x64xi1>, vector<64x64xf32>
    %cst_15 = arith.constant dense<0x7F800000> : vector<64xf32>
    %39 = vector.multi_reduction <minimumf>, %38, %cst_15 [1] : vector<64x64xf32> to vector<64xf32>
    %40 = vector.shape_cast %39 : vector<64xf32> to vector<64x1xf32>
    %41 = arith.fptosi %40 : vector<64x1xf32> to vector<64x1xi32>
    %42 = vector.broadcast %40 : vector<64x1xf32> to vector<64x64xf32>
    %43 = arith.cmpf oeq, %6, %42 : vector<64x64xf32>
    %cst_16 = arith.constant 0xFF800000 : f32
    %44 = vector.broadcast %cst_16 : f32 to vector<64x64xf32>
    %45 = arith.select %43, %44, %32 : vector<64x64xi1>, vector<64x64xf32>
    %cst_17 = arith.constant dense<0xFF800000> : vector<64xf32>
    %46 = vector.multi_reduction <maximumf>, %45, %cst_17 [1] : vector<64x64xf32> to vector<64xf32>
    %47 = vector.shape_cast %46 : vector<64xf32> to vector<64x1xf32>
    %48 = vector.broadcast %47 : vector<64x1xf32> to vector<64x64xf32>
    %49 = arith.cmpf oge, %45, %48 : vector<64x64xf32>
    %cst_18 = arith.constant 6.400000e+01 : f32
    %50 = vector.broadcast %cst_18 : f32 to vector<64x64xf32>
    %51 = arith.select %49, %6, %50 : vector<64x64xi1>, vector<64x64xf32>
    %cst_19 = arith.constant dense<0x7F800000> : vector<64xf32>
    %52 = vector.multi_reduction <minimumf>, %51, %cst_19 [1] : vector<64x64xf32> to vector<64xf32>
    %53 = vector.shape_cast %52 : vector<64xf32> to vector<64x1xf32>
    %54 = arith.fptosi %53 : vector<64x1xf32> to vector<64x1xi32>
    %55 = tpu.concatenate %15, %28, %41, %54 in 1 : vector<64x1xi32>, vector<64x1xi32>, vector<64x1xi32>, vector<64x1xi32> -> vector<64x4xi32>
    %c0_20 = arith.constant 0 : index
    %c0_21 = arith.constant 0 : index
    %c0_22 = arith.constant 0 : index
    %56 = vector.load %arg4[%c0_20, %c0_21, %c0_22] : memref<1x64x4xi32, #tpu.memory_space<vmem>>, vector<1x64x4xi32>
    %57 = vector.shape_cast %56 : vector<1x64x4xi32> to vector<64x4xi32>
    %58 = vector.shape_cast %55 : vector<64x4xi32> to vector<1x64x4xi32>
    tpu.vector_store %arg4[%c0_20, %c0_21, %c0_22], %58 {strides = array<i32>} : memref<1x64x4xi32, #tpu.memory_space<vmem>>, vector<1x64x4xi32>,
    return
  }
  func.func @transform_0(%arg0: i32, %arg1: i32) -> (i32, i32, i32) {
    %c0_i32 = arith.constant 0 : i32
    %c0_i32_0 = arith.constant 0 : i32
    return %arg0, %arg1, %c0_i32 : i32, i32, i32
  }
  func.func @transform_1(%arg0: i32, %arg1: i32) -> (i32, i32, i32) {
    %c0_i32 = arith.constant 0 : i32
    %c0_i32_0 = arith.constant 0 : i32
    %c0_i32_1 = arith.constant 0 : i32
    return %arg0, %c0_i32, %c0_i32_0 : i32, i32, i32
  }
  func.func @transform_2(%arg0: i32, %arg1: i32) -> (i32, i32, i32) {
    %c0_i32 = arith.constant 0 : i32
    %c0_i32_0 = arith.constant 0 : i32
    return %arg0, %arg1, %c0_i32 : i32, i32, i32
  }
}

module attributes {stable_mosaic.version = 11 : i64} {
  func.func @_nbr_mlp_sum_kernel(%arg0: i32, %arg1: i32, %arg2: memref<256x64xf32, #tpu.memory_space<vmem>>, %arg3: memref<64x64xf32, #tpu.memory_space<vmem>>, %arg4: memref<1x64xf32, #tpu.memory_space<vmem>>, %arg5: memref<1x1x64xf32, #tpu.memory_space<vmem>>) attributes {dimension_semantics = [#tpu.dimension_semantics<parallel>, #tpu.dimension_semantics<arbitrary>], iteration_bounds = array<i64: 2, 1>, scalar_prefetch = 0 : i64, scratch_operands = 0 : i64, tpu.core_type = #tpu.core_type<tc>, window_params = [{transform_indices = @transform_0, window_bounds = array<i64: 256, 64>}, {pipeline_mode = #tpu.pipeline_mode<synchronous>, transform_indices = @transform_1, window_bounds = array<i64: 64, 64>}, {pipeline_mode = #tpu.pipeline_mode<synchronous>, transform_indices = @transform_2, window_bounds = array<i64: 1, 64>}, {transform_indices = @transform_3, window_bounds = array<i64: 1, 1, 64>}]} {
    %c0_i32 = arith.constant 0 : i32
    %0 = arith.cmpi eq, %arg1, %c0_i32 : i32
    %1 = arith.extui %0 : i1 to i32
    %c0_i32_0 = arith.constant 0 : i32
    %2 = arith.cmpi ne, %1, %c0_i32_0 : i32
    scf.if %2 {
      %cst_16 = arith.constant 0.000000e+00 : f32
      %22 = vector.broadcast %cst_16 : f32 to vector<1x1x64xf32>
      %c0_17 = arith.constant 0 : index
      %c0_18 = arith.constant 0 : index
      %c0_19 = arith.constant 0 : index
      %23 = vector.load %arg5[%c0_17, %c0_18, %c0_19] : memref<1x1x64xf32, #tpu.memory_space<vmem>>, vector<1x1x64xf32>
      tpu.vector_store %arg5[%c0_17, %c0_18, %c0_19], %22 {strides = array<i32>} : memref<1x1x64xf32, #tpu.memory_space<vmem>>, vector<1x1x64xf32>,
    } else {
    }
    %c0 = arith.constant 0 : index
    %c0_1 = arith.constant 0 : index
    %3 = vector.load %arg2[%c0, %c0_1] : memref<256x64xf32, #tpu.memory_space<vmem>>, vector<256x64xf32>
    %c0_2 = arith.constant 0 : index
    %c0_3 = arith.constant 0 : index
    %4 = vector.load %arg3[%c0_2, %c0_3] : memref<64x64xf32, #tpu.memory_space<vmem>>, vector<64x64xf32>
    %cst = arith.constant dense<0.000000e+00> : vector<256x64xf32>
    %5 = tpu.matmul %3, %4, %cst {dimension_numbers = #tpu.dot_dimension_numbers<[1], [0], [0], [1], [0, 0, 1, 1], [], []>} : vector<256x64xf32>, vector<64x64xf32>, vector<256x64xf32> -> vector<256x64xf32>
    %c0_4 = arith.constant 0 : index
    %c0_5 = arith.constant 0 : index
    %6 = vector.load %arg4[%c0_4, %c0_5] : memref<1x64xf32, #tpu.memory_space<vmem>>, vector<1x64xf32>
    %7 = vector.broadcast %6 : vector<1x64xf32> to vector<256x64xf32>
    %8 = arith.addf %5, %7 : vector<256x64xf32>
    %cst_6 = arith.constant 0.000000e+00 : f32
    %9 = vector.broadcast %cst_6 : f32 to vector<256x64xf32>
    %10 = arith.cmpf oge, %8, %9 : vector<256x64xf32>
    %cst_7 = arith.constant 0.00999999977 : f32
    %11 = vector.broadcast %cst_7 : f32 to vector<256x64xf32>
    %12 = arith.mulf %11, %8 : vector<256x64xf32>
    %13 = arith.select %10, %8, %12 : vector<256x64xi1>, vector<256x64xf32>
    %cst_8 = arith.constant 1.000000e+00 : f32
    %14 = vector.broadcast %cst_8 : f32 to vector<1x256xf32>
    %c0_9 = arith.constant 0 : index
    %c0_10 = arith.constant 0 : index
    %c0_11 = arith.constant 0 : index
    %15 = vector.load %arg5[%c0_9, %c0_10, %c0_11] : memref<1x1x64xf32, #tpu.memory_space<vmem>>, vector<1x1x64xf32>
    %16 = vector.shape_cast %15 : vector<1x1x64xf32> to vector<1x64xf32>
    %cst_12 = arith.constant dense<0.000000e+00> : vector<1x64xf32>
    %17 = tpu.matmul %14, %13, %cst_12 {dimension_numbers = #tpu.dot_dimension_numbers<[1], [0], [0], [1], [0, 0, 1, 1], [], []>} : vector<1x256xf32>, vector<256x64xf32>, vector<1x64xf32> -> vector<1x64xf32>
    %18 = arith.addf %16, %17 : vector<1x64xf32>
    %c0_13 = arith.constant 0 : index
    %c0_14 = arith.constant 0 : index
    %c0_15 = arith.constant 0 : index
    %19 = vector.load %arg5[%c0_13, %c0_14, %c0_15] : memref<1x1x64xf32, #tpu.memory_space<vmem>>, vector<1x1x64xf32>
    %20 = vector.shape_cast %19 : vector<1x1x64xf32> to vector<1x64xf32>
    %21 = vector.shape_cast %18 : vector<1x64xf32> to vector<1x1x64xf32>
    tpu.vector_store %arg5[%c0_13, %c0_14, %c0_15], %21 {strides = array<i32>} : memref<1x1x64xf32, #tpu.memory_space<vmem>>, vector<1x1x64xf32>,
    return
  }
  func.func @transform_0(%arg0: i32, %arg1: i32) -> (i32, i32) {
    %c1_i32 = arith.constant 1 : i32
    %0 = arith.muli %arg0, %c1_i32 : i32
    %1 = arith.addi %0, %arg1 : i32
    %c0_i32 = arith.constant 0 : i32
    %c0_i32_0 = arith.constant 0 : i32
    return %1, %c0_i32 : i32, i32
  }
  func.func @transform_1(%arg0: i32, %arg1: i32) -> (i32, i32) {
    %c0_i32 = arith.constant 0 : i32
    %c0_i32_0 = arith.constant 0 : i32
    %c0_i32_1 = arith.constant 0 : i32
    return %c0_i32, %c0_i32_0 : i32, i32
  }
  func.func @transform_2(%arg0: i32, %arg1: i32) -> (i32, i32) {
    %c0_i32 = arith.constant 0 : i32
    %c0_i32_0 = arith.constant 0 : i32
    %c0_i32_1 = arith.constant 0 : i32
    return %c0_i32, %c0_i32_0 : i32, i32
  }
  func.func @transform_3(%arg0: i32, %arg1: i32) -> (i32, i32, i32) {
    %c0_i32 = arith.constant 0 : i32
    %c0_i32_0 = arith.constant 0 : i32
    %c0_i32_1 = arith.constant 0 : i32
    return %arg0, %c0_i32, %c0_i32_0 : i32, i32, i32
  }
}

module attributes {stable_mosaic.version = 11 : i64} {
  func.func @_se_combine_kernel(%arg0: i32, %arg1: i32, %arg2: memref<1x1x64xf32, #tpu.memory_space<vmem>>, %arg3: memref<64x2xf32, #tpu.memory_space<vmem>>, %arg4: memref<1x2xf32, #tpu.memory_space<vmem>>, %arg5: memref<2x128xf32, #tpu.memory_space<vmem>>, %arg6: memref<1x128xf32, #tpu.memory_space<vmem>>, %arg7: memref<1x16x128xf32, #tpu.memory_space<vmem>>, %arg8: memref<1x16x128xf32, #tpu.memory_space<vmem>>, %arg9: memref<1x1xf32, #tpu.memory_space<smem>>, %arg10: memref<1x1xf32, #tpu.memory_space<smem>>, %arg11: memref<1x16x128xf32, #tpu.memory_space<vmem>>, %arg12: memref<1x128xf32, #tpu.memory_space<vmem>>) attributes {dimension_semantics = [#tpu.dimension_semantics<parallel>, #tpu.dimension_semantics<arbitrary>], iteration_bounds = array<i64: 2, 1>, scalar_prefetch = 0 : i64, scratch_operands = 1 : i64, tpu.core_type = #tpu.core_type<tc>, window_params = [{transform_indices = @transform_0, window_bounds = array<i64: 1, 1, 64>}, {pipeline_mode = #tpu.pipeline_mode<synchronous>, transform_indices = @transform_1, window_bounds = array<i64: 64, 2>}, {pipeline_mode = #tpu.pipeline_mode<synchronous>, transform_indices = @transform_2, window_bounds = array<i64: 1, 2>}, {pipeline_mode = #tpu.pipeline_mode<synchronous>, transform_indices = @transform_3, window_bounds = array<i64: 2, 128>}, {pipeline_mode = #tpu.pipeline_mode<synchronous>, transform_indices = @transform_4, window_bounds = array<i64: 1, 128>}, {transform_indices = @transform_5, window_bounds = array<i64: 1, 16, 128>}, {transform_indices = @transform_6, window_bounds = array<i64: 1, 16, 128>}, {transform_indices = @transform_7, window_bounds = array<i64: 1, 1>}, {transform_indices = @transform_8, window_bounds = array<i64: 1, 1>}, {transform_indices = @transform_9, window_bounds = array<i64: 1, 16, 128>}]} {
    %c0_i32 = arith.constant 0 : i32
    %0 = arith.cmpi eq, %arg1, %c0_i32 : i32
    %1 = arith.extui %0 : i1 to i32
    %c0_i32_0 = arith.constant 0 : i32
    %2 = arith.cmpi ne, %1, %c0_i32_0 : i32
    scf.if %2 {
      %c0_16 = arith.constant 0 : index
      %c0_17 = arith.constant 0 : index
      %c0_18 = arith.constant 0 : index
      %26 = vector.load %arg2[%c0_16, %c0_17, %c0_18] : memref<1x1x64xf32, #tpu.memory_space<vmem>>, vector<1x1x64xf32>
      %27 = vector.shape_cast %26 : vector<1x1x64xf32> to vector<1x64xf32>
      %c0_19 = arith.constant 0 : index
      %c0_20 = arith.constant 0 : index
      %28 = vector.load %arg3[%c0_19, %c0_20] : memref<64x2xf32, #tpu.memory_space<vmem>>, vector<64x2xf32>
      %cst_21 = arith.constant dense<0.000000e+00> : vector<1x2xf32>
      %29 = tpu.matmul %27, %28, %cst_21 {dimension_numbers = #tpu.dot_dimension_numbers<[1], [0], [0], [1], [0, 0, 1, 1], [], []>} : vector<1x64xf32>, vector<64x2xf32>, vector<1x2xf32> -> vector<1x2xf32>
      %c0_22 = arith.constant 0 : index
      %c0_23 = arith.constant 0 : index
      %30 = vector.load %arg4[%c0_22, %c0_23] : memref<1x2xf32, #tpu.memory_space<vmem>>, vector<1x2xf32>
      %31 = arith.addf %29, %30 : vector<1x2xf32>
      %cst_24 = arith.constant 0.000000e+00 : f32
      %32 = vector.broadcast %cst_24 : f32 to vector<1x2xf32>
      %33 = arith.cmpf oge, %31, %32 : vector<1x2xf32>
      %cst_25 = arith.constant 0.00999999977 : f32
      %34 = vector.broadcast %cst_25 : f32 to vector<1x2xf32>
      %35 = arith.mulf %34, %31 : vector<1x2xf32>
      %36 = arith.select %33, %31, %35 : vector<1x2xi1>, vector<1x2xf32>
      %c0_26 = arith.constant 0 : index
      %c0_27 = arith.constant 0 : index
      %37 = vector.load %arg5[%c0_26, %c0_27] : memref<2x128xf32, #tpu.memory_space<vmem>>, vector<2x128xf32>
      %cst_28 = arith.constant dense<0.000000e+00> : vector<1x128xf32>
      %38 = tpu.matmul %36, %37, %cst_28 {dimension_numbers = #tpu.dot_dimension_numbers<[1], [0], [0], [1], [0, 0, 1, 1], [], []>} : vector<1x2xf32>, vector<2x128xf32>, vector<1x128xf32> -> vector<1x128xf32>
      %c0_29 = arith.constant 0 : index
      %c0_30 = arith.constant 0 : index
      %39 = vector.load %arg6[%c0_29, %c0_30] : memref<1x128xf32, #tpu.memory_space<vmem>>, vector<1x128xf32>
      %40 = arith.addf %38, %39 : vector<1x128xf32>
      %41 = arith.negf %40 : vector<1x128xf32>
      %42 = math.exp %41 : vector<1x128xf32>
      %cst_31 = arith.constant 1.000000e+00 : f32
      %43 = vector.broadcast %cst_31 : f32 to vector<1x128xf32>
      %44 = arith.addf %43, %42 : vector<1x128xf32>
      %45 = arith.divf %43, %44 : vector<1x128xf32>
      %c0_32 = arith.constant 0 : index
      %c0_33 = arith.constant 0 : index
      %46 = vector.load %arg12[%c0_32, %c0_33] : memref<1x128xf32, #tpu.memory_space<vmem>>, vector<1x128xf32>
      tpu.vector_store %arg12[%c0_32, %c0_33], %45 {strides = array<i32>} : memref<1x128xf32, #tpu.memory_space<vmem>>, vector<1x128xf32>,
    } else {
    }
    %c0 = arith.constant 0 : index
    %c0_1 = arith.constant 0 : index
    %3 = vector.load %arg12[%c0, %c0_1] : memref<1x128xf32, #tpu.memory_space<vmem>>, vector<1x128xf32>
    %c0_2 = arith.constant 0 : index
    %c0_3 = arith.constant 0 : index
    %c0_4 = arith.constant 0 : index
    %4 = vector.load %arg7[%c0_2, %c0_3, %c0_4] : memref<1x16x128xf32, #tpu.memory_space<vmem>>, vector<1x16x128xf32>
    %5 = vector.shape_cast %4 : vector<1x16x128xf32> to vector<16x128xf32>
    %6 = vector.broadcast %3 : vector<1x128xf32> to vector<16x128xf32>
    %7 = arith.mulf %6, %5 : vector<16x128xf32>
    %cst = arith.constant 1.000000e+00 : f32
    %8 = vector.broadcast %cst : f32 to vector<1x128xf32>
    %9 = arith.subf %8, %3 : vector<1x128xf32>
    %c0_5 = arith.constant 0 : index
    %c0_6 = arith.constant 0 : index
    %c0_7 = arith.constant 0 : index
    %10 = vector.load %arg8[%c0_5, %c0_6, %c0_7] : memref<1x16x128xf32, #tpu.memory_space<vmem>>, vector<1x16x128xf32>
    %11 = vector.shape_cast %10 : vector<1x16x128xf32> to vector<16x128xf32>
    %12 = vector.broadcast %9 : vector<1x128xf32> to vector<16x128xf32>
    %13 = arith.mulf %12, %11 : vector<16x128xf32>
    %c0_8 = arith.constant 0 : index
    %c0_9 = arith.constant 0 : index
    %14 = memref.load %arg9[%c0_8, %c0_9] : memref<1x1xf32, #tpu.memory_space<smem>>
    %c0_10 = arith.constant 0 : index
    %c0_11 = arith.constant 0 : index
    %15 = memref.load %arg10[%c0_10, %c0_11] : memref<1x1xf32, #tpu.memory_space<smem>>
    %16 = vector.broadcast %14 : f32 to vector<16x128xf32>
    %17 = arith.mulf %16, %7 : vector<16x128xf32>
    %18 = vector.broadcast %15 : f32 to vector<16x128xf32>
    %19 = arith.mulf %18, %13 : vector<16x128xf32>
    %20 = arith.addf %17, %19 : vector<16x128xf32>
    %cst_12 = arith.constant 0.000000e+00 : f32
    %21 = vector.broadcast %cst_12 : f32 to vector<16x128xf32>
    %22 = arith.maximumf %20, %21 : vector<16x128xf32>
    %c0_13 = arith.constant 0 : index
    %c0_14 = arith.constant 0 : index
    %c0_15 = arith.constant 0 : index
    %23 = vector.load %arg11[%c0_13, %c0_14, %c0_15] : memref<1x16x128xf32, #tpu.memory_space<vmem>>, vector<1x16x128xf32>
    %24 = vector.shape_cast %23 : vector<1x16x128xf32> to vector<16x128xf32>
    %25 = vector.shape_cast %22 : vector<16x128xf32> to vector<1x16x128xf32>
    tpu.vector_store %arg11[%c0_13, %c0_14, %c0_15], %25 {strides = array<i32>} : memref<1x16x128xf32, #tpu.memory_space<vmem>>, vector<1x16x128xf32>,
    return
  }
  func.func @transform_0(%arg0: i32, %arg1: i32) -> (i32, i32, i32) {
    %c0_i32 = arith.constant 0 : i32
    %c0_i32_0 = arith.constant 0 : i32
    %c0_i32_1 = arith.constant 0 : i32
    return %arg0, %c0_i32, %c0_i32_0 : i32, i32, i32
  }
  func.func @transform_1(%arg0: i32, %arg1: i32) -> (i32, i32) {
    %c0_i32 = arith.constant 0 : i32
    %c0_i32_0 = arith.constant 0 : i32
    %c0_i32_1 = arith.constant 0 : i32
    return %c0_i32, %c0_i32_0 : i32, i32
  }
  func.func @transform_2(%arg0: i32, %arg1: i32) -> (i32, i32) {
    %c0_i32 = arith.constant 0 : i32
    %c0_i32_0 = arith.constant 0 : i32
    %c0_i32_1 = arith.constant 0 : i32
    return %c0_i32, %c0_i32_0 : i32, i32
  }
  func.func @transform_3(%arg0: i32, %arg1: i32) -> (i32, i32) {
    %c0_i32 = arith.constant 0 : i32
    %c0_i32_0 = arith.constant 0 : i32
    %c0_i32_1 = arith.constant 0 : i32
    return %c0_i32, %c0_i32_0 : i32, i32
  }
  func.func @transform_4(%arg0: i32, %arg1: i32) -> (i32, i32) {
    %c0_i32 = arith.constant 0 : i32
    %c0_i32_0 = arith.constant 0 : i32
    %c0_i32_1 = arith.constant 0 : i32
    return %c0_i32, %c0_i32_0 : i32, i32
  }
  func.func @transform_5(%arg0: i32, %arg1: i32) -> (i32, i32, i32) {
    %c0_i32 = arith.constant 0 : i32
    %c0_i32_0 = arith.constant 0 : i32
    return %arg0, %arg1, %c0_i32 : i32, i32, i32
  }
  func.func @transform_6(%arg0: i32, %arg1: i32) -> (i32, i32, i32) {
    %c0_i32 = arith.constant 0 : i32
    %c0_i32_0 = arith.constant 0 : i32
    return %arg0, %arg1, %c0_i32 : i32, i32, i32
  }
  func.func @transform_7(%arg0: i32, %arg1: i32) -> (i32, i32) {
    %c0_i32 = arith.constant 0 : i32
    %c0_i32_0 = arith.constant 0 : i32
    %c0_i32_1 = arith.constant 0 : i32
    return %c0_i32, %c0_i32_0 : i32, i32
  }
  func.func @transform_8(%arg0: i32, %arg1: i32) -> (i32, i32) {
    %c0_i32 = arith.constant 0 : i32
    %c0_i32_0 = arith.constant 0 : i32
    %c0_i32_1 = arith.constant 0 : i32
    return %c0_i32, %c0_i32_0 : i32, i32
  }
  func.func @transform_9(%arg0: i32, %arg1: i32) -> (i32, i32, i32) {
    %c0_i32 = arith.constant 0 : i32
    %c0_i32_0 = arith.constant 0 : i32
    return %arg0, %arg1, %c0_i32 : i32, i32, i32
  }
}

</mosaic_0001>

<bundles_post_ra>
// kernel: tile.14
= control target key start
LH: loop header
LB: loop body
LE: loop exit
PB: predicated region body
PF: predicated region fallthrough
CT: control target
= control target key end

     0   :  { %s30_s10 = smov 3  ;;  %s11_s11 = smov 3  ;;  %vm13_vm0 = vcmask 261120   ;;  %vm20_vm1 = vcmask 1048320   ;;  %vm27_vm2 = vcmask 785920   ;;  %vm34_vm3 = vcmask 523520   ;;  %s70_s0 = inlined_call_operand.vmem [shape: f32[2,4,32], index: 0, kind: input, shape index: {}]   ;;  %s71_s1 = inlined_call_operand.vmem [shape: f32[2,128], index: 1, kind: output, shape index: {}]  }
   0x1   :  { %v44_v0 = vld [vmem:[%s70_s0 + $0x4] sm:$0xf]  ;;  %v9_v1 = vld [vmem:[%s70_s0] sm:$0xf]  ;;  %s16_s0 = smov 3  ;;  %s23_s12 = smov 3 }
   0x2   :  { %8 = vst [vmem:[#allocation1 + $0x8] sm:$0xf] %v44_v0  ;;  %10 = vst [vmem:[#allocation1] sm:$0xf] %v9_v1  ;;  %s48_s13 = smov 96   ;;  %s49_s14 = smov 32  }
   0x3   :  { %s50_s15 = smov 64  }
   0x9   :  { %v17_v2 = vld [vmem:[#allocation1 + $0x3] ss:$8 sm:%s16_s0]   ;;  %v31_v3 = vld [vmem:[#allocation1 + $0x1] ss:$8 sm:%s30_s10]   ;;  %v12_v4 = vld [vmem:[#allocation1] ss:$8 sm:%s11_s11]  }
   0xa   :  { %18 = vrot.lane.b32.xlu0 %v17_v2, %s48_s13  ;;  %32 = vrot.lane.b32.xlu1 %v31_v3, %s49_s14  ;;  %v24_v5 = vld [vmem:[#allocation1 + $0x2] ss:$8 sm:%s23_s12]   ;;  %14 = vst.msk [vmem:[#allocation0] sm:$0x3] %vm13_vm0, %v12_v4  }
   0xe   :  { %25 = vrot.lane.b32.xlu0 %v24_v5, %s50_s15 }
  0x7c   :  { %v19_v6 = vpop.permute.xlu0 %18   ;;  %v33_v7 = vpop.permute.xlu1 %32  }
  0x7d   :  { %21 = vst.msk [vmem:[#allocation0] sm:$0x3] %vm20_vm1, %v19_v6  }
  0x80   :  { %v26_v8 = vpop.permute.xlu0 %25  }
  0x81   :  { %28 = vst.msk [vmem:[#allocation0] sm:$0x3] %vm27_vm2, %v26_v8  }
  0x82   :  { %35 = vst.msk [vmem:[#allocation0] sm:$0x3] %vm34_vm3, %v33_v7  }
  0x89   :  { %v40_v9 = vld [vmem:[#allocation0] sm:$0x3] }
  0x8a   :  { %43 = vst [vmem:[%s71_s1] sm:$0x3] %v40_v9 }

// kernel: enet_gnn_forward.4
= control target key start
LH: loop header
LB: loop body
LE: loop exit
PB: predicated region body
PF: predicated region fallthrough
CT: control target
= control target key end

     0   :  { %s1028_s9 = smov 0   ;;  %s1030_s10 = smov 0   ;;  %s1452_s0 = inlined_call_operand.vmem [shape: bf16[2,64,32], index: 0, kind: input, shape index: {}, may-alias: {0,1}]   ;;  %s1453_s1 = inlined_call_operand.vmem [shape: bf16[2,64,32], index: 1, kind: input, shape index: {}, may-alias: {0,1}]   ;;  %s1454_s2 = inlined_call_operand.vmem [shape: s32[2,64,4], index: 2, kind: output, shape index: {}]  }
   0x1   :  { %s1032_s11 = smov 0  }
   0x2 LB: > { %s24_s12 = sadd.s32 1, %s1007_s10  ;;  %p829_p0 = scmp.ge.s32.totalorder %s1011_s11, 1  ;;  %s1011_s11 = sphi %s1032_s11, %s12_s11   ;;  %s1007_s10 = sphi %s1030_s10, %s1456_s10   ;;  %s1003_s9 = sphi %s1028_s9, %s1455_s9  }
   0x3   : > { %p26_p1 = scmp.ge.s32.totalorder %s24_s12, 2  ;;  %p143_p2 = scmp.lt.s32.totalorder %s1011_s11, 3 }
   0x5   : > { %s1458_s12 = smov (%p26_p1, %s24_s12), 0  ;;  %p144_p3 = pnand %p829_p0, %p143_p2 }
   0x6   : > { %p179_p4 = scmp.lt.s32.totalorder (!%p144_p3), %s1003_s9, 1 }
   0x7   : > { %147 = sbr.rel (%p144_p3) target bundleno = 1391 (0x56f), region = 28 }
   0xc   : > { %s1460_s9 = smov (!%p179_p4, %s1003_s9), 1  ;;  %vm260_vm0 = vcmask 261120   ;;  %vm353_vm1 = vcmask 523264   ;;  %v350_v28 = vlaneseq }
   0xd   : > { %s850_s13 = sshll.u32 %s1460_s9, 5  ;;  %s852_s20 = sshll.u32 %s1460_s9, 6 }
   0xe   : > { %s192_s16 = scalar_lea.vmem %s1453_s1, %s850_s13  ;;  %s186_s19 = scalar_lea.vmem %s1452_s0, %s850_s13  ;;  %v351_v29 = vand.u32 127, %v350_v28 }
   0xf   : > { %v981_v0 = vld [vmem:[%s192_s16 + $0x18] sm:$0xff]   ;;  %v982_v1 = vld [vmem:[%s192_s16 + $0x10] sm:$0xff]   ;;  %v985_v3 = vld [vmem:[%s186_s19] sm:$0xff]   ;;  %s1401_s23 = scalar_lea.vmem %s1454_s2, %s852_s20 }
  0x10   : > { %885 = vmatprep.subr.msk.bf16.mxu0 %vm260_vm0, %v981_v0  ;;  %886 = vmatprep.subr.msk.bf16.mxu1 %vm260_vm0, %v981_v0  ;;  %v283_v2 = vsel %vm260_vm0, %v981_v0, 0  ;;  %v986_v4 = vld [vmem:[%s186_s19 + $0x10] sm:$0xff]   ;;  %v280_v5 = vsel %vm260_vm0, %v982_v1, 0  ;;  %v983_v6 = vld [vmem:[%s192_s16 + $0x8] sm:$0xff]   ;;  %v984_v8 = vld [vmem:[%s192_s16] sm:$0xff]   ;;  %v1103_v30 = vcvt.s32.f32 %v351_v29 }
  0x11   : > { %862 = vmatpush3.bf16.xpose.msra.mxu0 %v283_v2  ;;  %881 = vmatpush3.bf16.xpose.msra.mxu1 %v283_v2  ;;  %v277_v7 = vsel %vm260_vm0, %v983_v6, 0  ;;  %v274_v9 = vsel %vm260_vm0, %v984_v8, 0  ;;  %v987_v10 = vld [vmem:[%s186_s19 + $0x8] sm:$0xff]   ;;  %v988_v11 = vld [vmem:[%s186_s19 + $0x18] sm:$0xff]  }
  0x12   : > { %887 = vmatprep.subr.msk.bf16.mxu0 %vm260_vm0, %v982_v1  ;;  %888 = vmatprep.subr.msk.bf16.mxu1 %vm260_vm0, %v982_v1 }
  0x13   : > { %869 = vmatprep.mubr.msk.bf16.mxu0 %vm260_vm0, %v985_v3  ;;  %873 = vmatprep.mubr.msk.bf16.mxu1 %vm260_vm0, %v986_v4 }
  0x19   : > { %864 = vmatpush3.bf16.xpose.msra.mxu0 %v280_v5  ;;  %882 = vmatpush3.bf16.xpose.msra.mxu1 %v280_v5 }
  0x1a   : > { %889 = vmatprep.subr.msk.bf16.mxu0 %vm260_vm0, %v983_v6  ;;  %890 = vmatprep.subr.msk.bf16.mxu1 %vm260_vm0, %v983_v6 }
  0x21   : > { %866 = vmatpush3.bf16.xpose.msra.mxu0 %v277_v7  ;;  %883 = vmatpush3.bf16.xpose.msra.mxu1 %v277_v7 }
  0x22   : > { %891 = vmatprep.subr.msk.bf16.mxu0 %vm260_vm0, %v984_v8  ;;  %892 = vmatprep.subr.msk.bf16.mxu1 %vm260_vm0, %v984_v8 }
  0x29   : > { %868 = vmatpush3.bf16.xpose.msra.mxu0 %v274_v9  ;;  %884 = vmatpush3.bf16.xpose.msra.mxu1 %v274_v9 }
  0x30   : > { %870 = vmatmul.mubr.msk.bf16.vlgmr.msra.gmra.mxu0 %vm260_vm0, %v987_v10  ;;  %874 = vmatmul.mubr.msk.bf16.vlgmr.msra.gmra.mxu1 %vm260_vm0, %v988_v11 }
  0xf0   : > { %v1071_v12 = vpop.f32.mrf.mxu0  ;;  %v1073_v13 = vpop.f32.mrf.mxu1 }
  0xf1   : > { %v360_v14 = vsel %vm353_vm1, %v1071_v12, -inf  ;;  %v372_v27 = vsel %vm353_vm1, %v1073_v13, -inf }
  0xf2   : > { %v1077_v15 = vpop.f32.mrf.mxu1  ;;  %361 = vmax.xlane.f32.xlu1 %v360_v14  ;;  %v1079_v16 = vpop.f32.mrf.mxu0 }
  0xf3   : > { %v354_v17 = vsel %vm353_vm1, %v1079_v16, -inf  ;;  %v366_v22 = vsel %vm353_vm1, %v1077_v15, -inf }
  0xf4   : > { %v1083_v18 = vpop.f32.mrf.mxu1  ;;  %355 = vmax.xlane.f32.xlu0 %v354_v17  ;;  %v1085_v19 = vpop.f32.mrf.mxu0 }
  0xf5   : > { %v363_v20 = vsel %vm353_vm1, %v1085_v19, -inf  ;;  %v375_v26 = vsel %vm353_vm1, %v1083_v18, -inf }
  0xf6   : > { %v1089_v21 = vpop.f32.mrf.mxu1  ;;  %364 = vmax.xlane.f32.xlu1 %v363_v20  ;;  %v1093_v23 = vpop.f32.mrf.mxu0 }
  0xf7   : > { %v369_v24 = vsel %vm353_vm1, %v1089_v21, -inf  ;;  %v357_v25 = vsel %vm353_vm1, %v1093_v23, -inf }
  0xf8   : > { %367 = vmax.xlane.f32.xlu0 %v366_v22 }
  0xfa   : > { %370 = vmax.xlane.f32.xlu1 %v369_v24 }
  0xfc   : > { %358 = vmax.xlane.f32.xlu0 %v357_v25 }
  0xfe   : > { %376 = vmax.xlane.f32.xlu1 %v375_v26 }
 0x100   : > { %373 = vmax.xlane.f32.xlu0 %v372_v27 }
 0x17b   : > { %v362_v31 = vpop.xlane.xlu1 %361 }
 0x17c   : > { %vm380_vm2 = vcmp.ge.f32.partialorder %v1071_v12, %v362_v31 }
 0x17d   : > { %v356_v32 = vpop.xlane.xlu0 %355  ;;  %v388_v33 = vsel %vm380_vm2, %v1103_v30, 64.0 }
 0x17e   : > { %vm378_vm3 = vcmp.ge.f32.partialorder %v1079_v16, %v356_v32  ;;  %v400_v34 = vsel %vm353_vm1, %v388_v33, inf }
 0x17f   : > { %v365_v35 = vpop.xlane.xlu1 %364  ;;  %401 = vmin.xlane.f32.xlu0 %v400_v34  ;;  %v386_v36 = vsel %vm378_vm3, %v1103_v30, 64.0 }
 0x180   : > { %vm381_vm4 = vcmp.ge.f32.partialorder %v1085_v19, %v365_v35  ;;  %v394_v40 = vsel %vm353_vm1, %v386_v36, inf }
 0x181   : > { %v368_v37 = vpop.xlane.xlu0 %367  ;;  %v389_v38 = vsel %vm381_vm4, %v1103_v30, 64.0 }
 0x182   : > { %vm382_vm5 = vcmp.ge.f32.partialorder %v1077_v15, %v368_v37  ;;  %v403_v39 = vsel %vm353_vm1, %v389_v38, inf }
 0x183   : > { %404 = vmin.xlane.f32.xlu1 %v403_v39  ;;  %v371_v41 = vpop.xlane.xlu1 %370  ;;  %395 = vmin.xlane.f32.xlu0 %v394_v40  ;;  %v390_v42 = vsel %vm382_vm5, %v1103_v30, 64.0 }
 0x184   : > { %vm383_vm6 = vcmp.ge.f32.partialorder %v1089_v21, %v371_v41  ;;  %v406_v44 = vsel %vm353_vm1, %v390_v42, inf }
 0x185   : > { %v359_v43 = vpop.xlane.xlu0 %358  ;;  %v391_v49 = vsel %vm383_vm6, %v1103_v30, 64.0 }
 0x186   : > { %vm379_vm7 = vcmp.ge.f32.partialorder %v1093_v23, %v359_v43  ;;  %v409_v51 = vsel %vm353_vm1, %v391_v49, inf }
 0x187   : > { %v377_v45 = vpop.xlane.xlu1 %376  ;;  %407 = vmin.xlane.f32.xlu0 %v406_v44  ;;  %v387_v46 = vsel %vm379_vm7, %v1103_v30, 64.0 }
 0x188   : > { %v397_v47 = vsel %vm353_vm1, %v387_v46, inf  ;;  %vm385_vm8 = vcmp.ge.f32.partialorder %v1083_v18, %v377_v45 }
 0x189   : > { %398 = vmin.xlane.f32.xlu1 %v397_v47  ;;  %v374_v48 = vpop.xlane.xlu0 %373  ;;  %v393_v53 = vsel %vm385_vm8, %v1103_v30, 64.0 }
 0x18a   : > { %vm384_vm9 = vcmp.ge.f32.partialorder %v1073_v13, %v374_v48  ;;  %v415_v54 = vsel %vm353_vm1, %v393_v53, inf }
 0x18b   : > { %v392_v50 = vsel %vm384_vm9, %v1103_v30, 64.0 }
 0x18c   : > { %v412_v52 = vsel %vm353_vm1, %v392_v50, inf }
 0x18d   : > { %410 = vmin.xlane.f32.xlu1 %v409_v51  ;;  %413 = vmin.xlane.f32.xlu0 %v412_v52 }
 0x191   : > { %416 = vmin.xlane.f32.xlu1 %v415_v54 }
 0x208   : > { %v1129_v55 = vpop.xlane.xlu0 %401 }
 0x209   : > { %vm428_vm10 = vcmp.eq.f32.partialorder %v1103_v30, %v1129_v55  ;;  %v897_v40 = vtrunc.f32 %v1129_v55 }
 0x20a   : > { %v1134_v56 = vsel %vm428_vm10, -inf, %v1071_v12 }
 0x20b   : > { %v448_v57 = vsel %vm353_vm1, %v1134_v56, -inf  ;;  %v898_v46 = vcvt.f32.s32 %v897_v40 }
 0x20c   : > { %v1138_v58 = vpop.xlane.xlu1 %404  ;;  %449 = vmax.xlane.f32.xlu0 %v448_v57  ;;  %v1140_v59 = vpop.xlane.xlu0 %395 }
 0x20d   : > { %vm429_vm11 = vcmp.eq.f32.partialorder %v1103_v30, %v1138_v58  ;;  %vm426_vm12 = vcmp.eq.f32.partialorder %v1103_v30, %v1140_v59  ;;  %v899_v41 = vtrunc.f32 %v1138_v58  ;;  %v893_v44 = vtrunc.f32 %v1140_v59 }
 0x20e   : > { %v1147_v60 = vsel %vm429_vm11, -inf, %v1085_v19  ;;  %v1150_v61 = vsel %vm426_vm12, -inf, %v1079_v16  ;;  %vm690_vm12 = vcmask 7168  }
 0x20f   : > { %v451_v62 = vsel %vm353_vm1, %v1147_v60, -inf  ;;  %v442_v63 = vsel %vm353_vm1, %v1150_v61, -inf  ;;  %v900_v49 = vcvt.f32.s32 %v899_v41  ;;  %v894_v55 = vcvt.f32.s32 %v893_v44 }
 0x210   : > { %452 = vmax.xlane.f32.xlu1 %v451_v62  ;;  %443 = vmax.xlane.f32.xlu0 %v442_v63  ;;  %v1156_v0 = vpop.xlane.xlu0 %407 }
 0x211   : > { %vm430_vm13 = vcmp.eq.f32.partialorder %v1103_v30, %v1156_v0 }
 0x212   : > { %v1160_v1 = vpop.xlane.xlu1 %398  ;;  %v1163_v2 = vsel %vm430_vm13, -inf, %v1077_v15 }
 0x213   : > { %vm427_vm14 = vcmp.eq.f32.partialorder %v1103_v30, %v1160_v1  ;;  %v454_v3 = vsel %vm353_vm1, %v1163_v2, -inf }
 0x214   : > { %455 = vmax.xlane.f32.xlu0 %v454_v3  ;;  %v1170_v4 = vsel %vm427_vm14, -inf, %v1093_v23  ;;  %v895_v3 = vtrunc.f32 %v1160_v1 }
 0x215   : > { %v445_v5 = vsel %vm353_vm1, %v1170_v4, -inf }
 0x216   : > { %446 = vmax.xlane.f32.xlu1 %v445_v5  ;;  %v1174_v6 = vpop.xlane.xlu1 %410  ;;  %v1176_v7 = vpop.xlane.xlu0 %413 }
 0x217   : > { %vm431_vm15 = vcmp.eq.f32.partialorder %v1103_v30, %v1174_v6  ;;  %vm432_vm0 = vcmp.eq.f32.partialorder %v1103_v30, %v1176_v7 }
 0x218   : > { %v1183_v8 = vsel %vm431_vm15, -inf, %v1089_v21  ;;  %v1186_v9 = vsel %vm432_vm0, -inf, %v1073_v13 }
 0x219   : > { %v457_v10 = vsel %vm353_vm1, %v1183_v8, -inf  ;;  %v460_v11 = vsel %vm353_vm1, %v1186_v9, -inf }
 0x21a   : > { %458 = vmax.xlane.f32.xlu1 %v457_v10  ;;  %v1192_v12 = vpop.xlane.xlu1 %416  ;;  %461 = vmax.xlane.f32.xlu0 %v460_v11 }
 0x21b   : > { %vm433_vm2 = vcmp.eq.f32.partialorder %v1103_v30, %v1192_v12 }
 0x21c   : > { %v1197_v14 = vsel %vm433_vm2, -inf, %v1083_v18 }
 0x21d   : > { %v463_v13 = vsel %vm353_vm1, %v1197_v14, -inf }
 0x21e   : > { %464 = vmax.xlane.f32.xlu1 %v463_v13 }
 0x295   : > { %v450_v15 = vpop.xlane.xlu0 %449 }
 0x296   : > { %vm468_vm3 = vcmp.ge.f32.partialorder %v1134_v56, %v450_v15 }
 0x297   : > { %v476_v16 = vsel %vm468_vm3, %v1103_v30, 64.0 }
 0x298   : > { %v488_v17 = vsel %vm353_vm1, %v476_v16, inf }
 0x299   : > { %v453_v19 = vpop.xlane.xlu1 %452  ;;  %489 = vmin.xlane.f32.xlu0 %v488_v17  ;;  %v444_v20 = vpop.xlane.xlu0 %443 }
 0x29a   : > { %vm469_vm4 = vcmp.ge.f32.partialorder %v1147_v60, %v453_v19  ;;  %vm466_vm5 = vcmp.ge.f32.partialorder %v1150_v61, %v444_v20  ;;  %v896_v19 = vcvt.f32.s32 %v895_v3 }
 0x29b   : > { %v477_v18 = vsel %vm469_vm4, %v1103_v30, 64.0  ;;  %v474_v21 = vsel %vm466_vm5, %v1103_v30, 64.0 }
 0x29c   : > { %v491_v22 = vsel %vm353_vm1, %v477_v18, inf  ;;  %v482_v23 = vsel %vm353_vm1, %v474_v21, inf  ;;  %v903_v18 = vtrunc.f32 %v1174_v6 }
 0x29d   : > { %492 = vmin.xlane.f32.xlu1 %v491_v22  ;;  %483 = vmin.xlane.f32.xlu0 %v482_v23  ;;  %v456_v24 = vpop.xlane.xlu0 %455 }
 0x29e   : > { %vm470_vm6 = vcmp.ge.f32.partialorder %v1163_v2, %v456_v24  ;;  %v904_v6 = vcvt.f32.s32 %v903_v18 }
 0x29f   : > { %v447_v25 = vpop.xlane.xlu1 %446  ;;  %v478_v26 = vsel %vm470_vm6, %v1103_v30, 64.0 }
 0x2a0   : > { %vm467_vm7 = vcmp.ge.f32.partialorder %v1170_v4, %v447_v25  ;;  %v494_v27 = vsel %vm353_vm1, %v478_v26, inf }
 0x2a1   : > { %495 = vmin.xlane.f32.xlu0 %v494_v27  ;;  %v475_v28 = vsel %vm467_vm7, %v1103_v30, 64.0 }
 0x2a2   : > { %v485_v29 = vsel %vm353_vm1, %v475_v28, inf }
 0x2a3   : > { %486 = vmin.xlane.f32.xlu1 %v485_v29  ;;  %v459_v31 = vpop.xlane.xlu1 %458  ;;  %v462_v32 = vpop.xlane.xlu0 %461 }
 0x2a4   : > { %vm471_vm8 = vcmp.ge.f32.partialorder %v1183_v8, %v459_v31  ;;  %vm472_vm9 = vcmp.ge.f32.partialorder %v1186_v9, %v462_v32 }
 0x2a5   : > { %v479_v33 = vsel %vm471_vm8, %v1103_v30, 64.0  ;;  %v480_v34 = vsel %vm472_vm9, %v1103_v30, 64.0 }
 0x2a6   : > { %v497_v35 = vsel %vm353_vm1, %v479_v33, inf  ;;  %v500_v36 = vsel %vm353_vm1, %v480_v34, inf }
 0x2a7   : > { %498 = vmin.xlane.f32.xlu1 %v497_v35  ;;  %v465_v37 = vpop.xlane.xlu1 %464  ;;  %501 = vmin.xlane.f32.xlu0 %v500_v36 }
 0x2a8   : > { %vm473_vm10 = vcmp.ge.f32.partialorder %v1197_v14, %v465_v37 }
 0x2a9   : > { %v481_v38 = vsel %vm473_vm10, %v1103_v30, 64.0 }
 0x2aa   : > { %v503_v39 = vsel %vm353_vm1, %v481_v38, inf }
 0x2ab   : > { %504 = vmin.xlane.f32.xlu1 %v503_v39 }
 0x322   : > { %v490_v42 = vpop.xlane.xlu0 %489 }
 0x323   : > { %v913_v43 = vtrunc.f32 %v490_v42  ;;  %vm516_vm11 = vcmp.eq.f32.partialorder %v1103_v30, %v490_v42 }
 0x324   : > { %v1230_v45 = vsel %vm516_vm11, -inf, %v1134_v56  ;;  %v901_v56 = vtrunc.f32 %v1156_v0 }
 0x325   : > { %v914_v47 = vcvt.f32.s32 %v913_v43  ;;  %v536_v48 = vsel %vm353_vm1, %v1230_v45, -inf }
 0x326   : > { %v493_v50 = vpop.xlane.xlu1 %492  ;;  %537 = vmax.xlane.f32.xlu0 %v536_v48  ;;  %v484_v51 = vpop.xlane.xlu0 %483  ;;  %v902_v13 = vcvt.f32.s32 %v901_v56 }
 0x327   : > { %v1235_v52 = vsel %vm690_vm12, %v898_v46, %v914_v47  ;;  %v915_v53 = vtrunc.f32 %v493_v50  ;;  %vm517_vm13 = vcmp.eq.f32.partialorder %v1103_v30, %v493_v50  ;;  %v909_v54 = vtrunc.f32 %v484_v51 }
 0x328   : > { %vm514_vm14 = vcmp.eq.f32.partialorder %v1103_v30, %v484_v51  ;;  %v1241_v57 = vsel %vm517_vm13, -inf, %v1147_v60 }
 0x329   : > { %v916_v58 = vcvt.f32.s32 %v915_v53  ;;  %v910_v59 = vcvt.f32.s32 %v909_v54  ;;  %v539_v62 = vsel %vm353_vm1, %v1241_v57, -inf  ;;  %v1246_v63 = vsel %vm514_vm14, -inf, %v1150_v61 }
 0x32a   : > { %540 = vmax.xlane.f32.xlu1 %v539_v62  ;;  %v530_v5 = vsel %vm353_vm1, %v1246_v63, -inf  ;;  %v496_v0 = vpop.xlane.xlu0 %495 }
 0x32b   : > { %v1252_v10 = vsel %vm690_vm12, %v900_v49, %v916_v58  ;;  %v1255_v60 = vsel %vm690_vm12, %v894_v55, %v910_v59  ;;  %531 = vmax.xlane.f32.xlu0 %v530_v5  ;;  %v917_v11 = vtrunc.f32 %v496_v0  ;;  %vm518_vm15 = vcmp.eq.f32.partialorder %v1103_v30, %v496_v0 }
 0x32c   : > { %v487_v61 = vpop.xlane.xlu1 %486  ;;  %v1259_v15 = vsel %vm518_vm15, -inf, %v1163_v2  ;;  %vm699_vm15 = vcmask 15360  }
 0x32d   : > { %v918_v1 = vcvt.f32.s32 %v917_v11  ;;  %v911_v16 = vtrunc.f32 %v487_v61  ;;  %vm515_vm0 = vcmp.eq.f32.partialorder %v1103_v30, %v487_v61  ;;  %v542_v17 = vsel %vm353_vm1, %v1259_v15, -inf }
 0x32e   : > { %v1265_v20 = vsel %vm515_vm0, -inf, %v1170_v4 }
 0x32f   : > { %v1269_v21 = vsel %vm690_vm12, %v902_v13, %v918_v1  ;;  %v912_v22 = vcvt.f32.s32 %v911_v16  ;;  %543 = vmax.xlane.f32.xlu0 %v542_v17  ;;  %v533_v2 = vsel %vm353_vm1, %v1265_v20, -inf }
 0x330   : > { %534 = vmax.xlane.f32.xlu1 %v533_v2  ;;  %v499_v23 = vpop.xlane.xlu1 %498  ;;  %v1273_v24 = vpop.xlane.xlu0 %501 }
 0x331   : > { %v1276_v25 = vsel %vm690_vm12, %v896_v19, %v912_v22  ;;  %v919_v26 = vtrunc.f32 %v499_v23  ;;  %vm519_vm2 = vcmp.eq.f32.partialorder %v1103_v30, %v499_v23  ;;  %vm520_vm3 = vcmp.eq.f32.partialorder %v1103_v30, %v1273_v24 }
 0x332   : > { %v1282_v4 = vsel %vm519_vm2, -inf, %v1183_v8  ;;  %v1287_v29 = vsel %vm520_vm3, -inf, %v1186_v9 }
 0x333   : > { %v920_v27 = vcvt.f32.s32 %v919_v26  ;;  %v545_v28 = vsel %vm353_vm1, %v1282_v4, -inf  ;;  %v548_v32 = vsel %vm353_vm1, %v1287_v29, -inf }
 0x334   : > { %546 = vmax.xlane.f32.xlu1 %v545_v28  ;;  %v1289_v31 = vpop.xlane.xlu1 %504  ;;  %549 = vmax.xlane.f32.xlu0 %v548_v32 }
 0x335   : > { %v1294_v33 = vsel %vm690_vm12, %v904_v6, %v920_v27  ;;  %vm521_vm4 = vcmp.eq.f32.partialorder %v1103_v30, %v1289_v31 }
 0x336   : > { %v1299_v8 = vsel %vm521_vm4, -inf, %v1197_v14 }
 0x337   : > { %v551_v9 = vsel %vm353_vm1, %v1299_v8, -inf }
 0x338   : > { %552 = vmax.xlane.f32.xlu1 %v551_v9 }
 0x3af   : > { %v538_v34 = vpop.xlane.xlu0 %537 }
 0x3b0   : > { %vm556_vm5 = vcmp.ge.f32.partialorder %v1230_v45, %v538_v34 }
 0x3b1   : > { %v564_v35 = vsel %vm556_vm5, %v1103_v30, 64.0 }
 0x3b2   : > { %v576_v36 = vsel %vm353_vm1, %v564_v35, inf }
 0x3b3   : > { %v541_v37 = vpop.xlane.xlu1 %540  ;;  %577 = vmin.xlane.f32.xlu0 %v576_v36 }
 0x3b4   : > { %vm557_vm6 = vcmp.ge.f32.partialorder %v1241_v57, %v541_v37  ;;  %v532_v38 = vpop.xlane.xlu0 %531 }
 0x3b5   : > { %vm554_vm7 = vcmp.ge.f32.partialorder %v1246_v63, %v532_v38  ;;  %v565_v14 = vsel %vm557_vm6, %v1103_v30, 64.0 }
 0x3b6   : > { %v579_v39 = vsel %vm353_vm1, %v565_v14, inf  ;;  %v562_v40 = vsel %vm554_vm7, %v1103_v30, 64.0 }
 0x3b7   : > { %580 = vmin.xlane.f32.xlu1 %v579_v39  ;;  %v570_v41 = vsel %vm353_vm1, %v562_v40, inf }
 0x3b8   : > { %571 = vmin.xlane.f32.xlu0 %v570_v41  ;;  %v544_v42 = vpop.xlane.xlu0 %543 }
 0x3b9   : > { %vm558_vm8 = vcmp.ge.f32.partialorder %v1259_v15, %v544_v42  ;;  %v535_v43 = vpop.xlane.xlu1 %534 }
 0x3ba   : > { %vm555_vm9 = vcmp.ge.f32.partialorder %v1265_v20, %v535_v43  ;;  %v566_v44 = vsel %vm558_vm8, %v1103_v30, 64.0 }
 0x3bb   : > { %v582_v46 = vsel %vm353_vm1, %v566_v44, inf  ;;  %v563_v47 = vsel %vm555_vm9, %v1103_v30, 64.0 }
 0x3bc   : > { %583 = vmin.xlane.f32.xlu0 %v582_v46  ;;  %v573_v48 = vsel %vm353_vm1, %v563_v47, inf }
 0x3bd   : > { %574 = vmin.xlane.f32.xlu1 %v573_v48  ;;  %v547_v49 = vpop.xlane.xlu1 %546  ;;  %v550_v50 = vpop.xlane.xlu0 %549 }
 0x3be   : > { %vm559_vm10 = vcmp.ge.f32.partialorder %v1282_v4, %v547_v49  ;;  %vm560_vm11 = vcmp.ge.f32.partialorder %v1287_v29, %v550_v50 }
 0x3bf   : > { %v567_v51 = vsel %vm559_vm10, %v1103_v30, 64.0  ;;  %v568_v54 = vsel %vm560_vm11, %v1103_v30, 64.0 }
 0x3c0   : > { %v585_v53 = vsel %vm353_vm1, %v567_v51, inf  ;;  %v588_v56 = vsel %vm353_vm1, %v568_v54, inf }
 0x3c1   : > { %586 = vmin.xlane.f32.xlu1 %v585_v53  ;;  %v553_v55 = vpop.xlane.xlu1 %552  ;;  %589 = vmin.xlane.f32.xlu0 %v588_v56 }
 0x3c2   : > { %vm561_vm13 = vcmp.ge.f32.partialorder %v1299_v8, %v553_v55 }
 0x3c3   : > { %v569_v58 = vsel %vm561_vm13, %v1103_v30, 64.0 }
 0x3c4   : > { %v591_v59 = vsel %vm353_vm1, %v569_v58, inf }
 0x3c5   : > { %592 = vmin.xlane.f32.xlu1 %v591_v59 }
 0x43c   : > { %v578_v62 = vpop.xlane.xlu0 %577 }
 0x43d   : > { %v929_v3 = vtrunc.f32 %v578_v62  ;;  %vm604_vm14 = vcmp.eq.f32.partialorder %v1103_v30, %v578_v62 }
 0x43e   : > { %v612_v5 = vsel %vm604_vm14, -inf, %v1230_v45 }
 0x43f   : > { %v930_v0 = vcvt.f32.s32 %v929_v3  ;;  %v624_v11 = vsel %vm353_vm1, %v612_v5, -inf }
 0x440   : > { %v581_v13 = vpop.xlane.xlu1 %580  ;;  %625 = vmax.xlane.f32.xlu0 %v624_v11 }
 0x441   : > { %v1332_v61 = vsel %vm699_vm15, %v1235_v52, %v930_v0  ;;  %v931_v1 = vtrunc.f32 %v581_v13  ;;  %vm605_vm0 = vcmp.eq.f32.partialorder %v1103_v30, %v581_v13  ;;  %v572_v16 = vpop.xlane.xlu0 %571 }
 0x442   : > { %v925_v17 = vtrunc.f32 %v572_v16  ;;  %vm602_vm2 = vcmp.eq.f32.partialorder %v1103_v30, %v572_v16  ;;  %v613_v19 = vsel %vm605_vm0, -inf, %v1241_v57 }
 0x443   : > { %v932_v18 = vcvt.f32.s32 %v931_v1  ;;  %v627_v45 = vsel %vm353_vm1, %v613_v19, -inf  ;;  %v610_v22 = vsel %vm602_vm2, -inf, %v1246_v63 }
 0x444   : > { %v926_v2 = vcvt.f32.s32 %v925_v17  ;;  %628 = vmax.xlane.f32.xlu1 %v627_v45  ;;  %v618_v23 = vsel %vm353_vm1, %v610_v22, -inf }
 0x445   : > { %v1342_v52 = vsel %vm699_vm15, %v1252_v10, %v932_v18  ;;  %619 = vmax.xlane.f32.xlu0 %v618_v23  ;;  %v584_v26 = vpop.xlane.xlu0 %583 }
 0x446   : > { %v1346_v6 = vsel %vm699_vm15, %v1255_v60, %v926_v2  ;;  %v933_v57 = vtrunc.f32 %v584_v26  ;;  %vm606_vm3 = vcmp.eq.f32.partialorder %v1103_v30, %v584_v26  ;;  %v575_v27 = vpop.xlane.xlu1 %574 }
 0x447   : > { %v927_v28 = vtrunc.f32 %v575_v27  ;;  %vm603_vm4 = vcmp.eq.f32.partialorder %v1103_v30, %v575_v27  ;;  %v614_v63 = vsel %vm606_vm3, -inf, %v1259_v15  ;;  %vm708_vm3 = vcmask 23552  }
 0x448   : > { %v934_v32 = vcvt.f32.s32 %v933_v57  ;;  %v630_v9 = vsel %vm353_vm1, %v614_v63, -inf  ;;  %v611_v10 = vsel %vm603_vm4, -inf, %v1265_v20  ;;  %vm717_vm4 = vcmask 31744  }
 0x449   : > { %v928_v34 = vcvt.f32.s32 %v927_v28  ;;  %631 = vmax.xlane.f32.xlu0 %v630_v9  ;;  %v621_v35 = vsel %vm353_vm1, %v611_v10, -inf  ;;  %v921_v28 = vtrunc.f32 %v1273_v24 }
 0x44a   : > { %v1356_v60 = vsel %vm699_vm15, %v1269_v21, %v934_v32  ;;  %622 = vmax.xlane.f32.xlu1 %v621_v35  ;;  %v587_v36 = vpop.xlane.xlu1 %586  ;;  %v1363_v38 = vpop.xlane.xlu0 %589  ;;  %v923_v35 = vtrunc.f32 %v1289_v31 }
 0x44b   : > { %v1360_v37 = vsel %vm699_vm15, %v1276_v25, %v928_v34  ;;  %v935_v15 = vtrunc.f32 %v587_v36  ;;  %vm607_vm5 = vcmp.eq.f32.partialorder %v1103_v30, %v587_v36  ;;  %vm608_vm6 = vcmp.eq.f32.partialorder %v1103_v30, %v1363_v38 }
 0x44c   : > { %v615_v20 = vsel %vm607_vm5, -inf, %v1282_v4  ;;  %v616_v39 = vsel %vm608_vm6, -inf, %v1287_v29  ;;  %v937_v9 = vtrunc.f32 %v1363_v38  ;;  %v905_v34 = vtrunc.f32 %v1176_v7 }
 0x44d   : > { %v936_v14 = vcvt.f32.s32 %v935_v15  ;;  %v633_v21 = vsel %vm353_vm1, %v615_v20, -inf  ;;  %v636_v25 = vsel %vm353_vm1, %v616_v39, -inf  ;;  %v922_v36 = vcvt.f32.s32 %v921_v28 }
 0x44e   : > { %634 = vmax.xlane.f32.xlu1 %v633_v21  ;;  %v1370_v40 = vpop.xlane.xlu1 %592  ;;  %637 = vmax.xlane.f32.xlu0 %v636_v25  ;;  %v938_v38 = vcvt.f32.s32 %v937_v9  ;;  %v906_v31 = vcvt.f32.s32 %v905_v34  ;;  %v924_v25 = vcvt.f32.s32 %v923_v35 }
 0x44f   : > { %v1375_v41 = vsel %vm699_vm15, %v1294_v33, %v936_v14  ;;  %vm609_vm7 = vcmp.eq.f32.partialorder %v1103_v30, %v1370_v40  ;;  %v939_v15 = vtrunc.f32 %v1370_v40  ;;  %v907_v14 = vtrunc.f32 %v1192_v12 }
 0x450   : > { %v617_v4 = vsel %vm609_vm7, -inf, %v1299_v8 }
 0x451   : > { %v639_v42 = vsel %vm353_vm1, %v617_v4, -inf  ;;  %v940_v12 = vcvt.f32.s32 %v939_v15 }
 0x452   : > { %640 = vmax.xlane.f32.xlu1 %v639_v42 }
 0x4c9   : > { %v626_v43 = vpop.xlane.xlu0 %625 }
 0x4ca   : > { %vm644_vm8 = vcmp.ge.f32.partialorder %v612_v5, %v626_v43 }
 0x4cb   : > { %v652_v29 = vsel %vm644_vm8, %v1103_v30, 64.0 }
 0x4cc   : > { %v664_v44 = vsel %vm353_vm1, %v652_v29, inf  ;;  %v908_v29 = vcvt.f32.s32 %v907_v14 }
 0x4cd   : > { %v629_v46 = vpop.xlane.xlu1 %628  ;;  %665 = vmin.xlane.f32.xlu0 %v664_v44 }
 0x4ce   : > { %vm645_vm9 = vcmp.ge.f32.partialorder %v613_v19, %v629_v46  ;;  %v620_v33 = vpop.xlane.xlu0 %619 }
 0x4cf   : > { %vm642_vm10 = vcmp.ge.f32.partialorder %v610_v22, %v620_v33  ;;  %v653_v47 = vsel %vm645_vm9, %v1103_v30, 64.0 }
 0x4d0   : > { %v667_v48 = vsel %vm353_vm1, %v653_v47, inf  ;;  %v650_v8 = vsel %vm642_vm10, %v1103_v30, 64.0  ;;  %v698_v47 = vsel %vm690_vm12, %v908_v29, %v924_v25 }
 0x4d1   : > { %668 = vmin.xlane.f32.xlu1 %v667_v48  ;;  %v658_v49 = vsel %vm353_vm1, %v650_v8, inf  ;;  %v707_v8 = vsel %vm699_vm15, %v698_v47, %v940_v12 }
 0x4d2   : > { %659 = vmin.xlane.f32.xlu0 %v658_v49  ;;  %v632_v50 = vpop.xlane.xlu0 %631 }
 0x4d3   : > { %vm646_vm11 = vcmp.ge.f32.partialorder %v614_v63, %v632_v50  ;;  %v623_v51 = vpop.xlane.xlu1 %622 }
 0x4d4   : > { %vm643_vm13 = vcmp.ge.f32.partialorder %v611_v10, %v623_v51  ;;  %v654_v53 = vsel %vm646_vm11, %v1103_v30, 64.0 }
 0x4d5   : > { %v670_v54 = vsel %vm353_vm1, %v654_v53, inf  ;;  %v651_v55 = vsel %vm643_vm13, %v1103_v30, 64.0 }
 0x4d6   : > { %671 = vmin.xlane.f32.xlu0 %v670_v54  ;;  %v661_v56 = vsel %vm353_vm1, %v651_v55, inf }
 0x4d7   : > { %662 = vmin.xlane.f32.xlu1 %v661_v56  ;;  %v635_v58 = vpop.xlane.xlu1 %634  ;;  %v638_v59 = vpop.xlane.xlu0 %637 }
 0x4d8   : > { %vm647_vm14 = vcmp.ge.f32.partialorder %v615_v20, %v635_v58  ;;  %vm648_vm0 = vcmp.ge.f32.partialorder %v616_v39, %v638_v59 }
 0x4d9   : > { %v655_v62 = vsel %vm647_vm14, %v1103_v30, 64.0  ;;  %v656_v5 = vsel %vm648_vm0, %v1103_v30, 64.0 }
 0x4da   : > { %v673_v3 = vsel %vm353_vm1, %v655_v62, inf  ;;  %v676_v11 = vsel %vm353_vm1, %v656_v5, inf }
 0x4db   : > { %674 = vmin.xlane.f32.xlu1 %v673_v3  ;;  %v641_v0 = vpop.xlane.xlu1 %640  ;;  %677 = vmin.xlane.f32.xlu0 %v676_v11 }
 0x4dc   : > { %vm649_vm2 = vcmp.ge.f32.partialorder %v617_v4, %v641_v0 }
 0x4dd   : > { %v657_v13 = vsel %vm649_vm2, %v1103_v30, 64.0 }
 0x4de   : > { %v679_v1 = vsel %vm353_vm1, %v657_v13, inf }
 0x4df   : > { %680 = vmin.xlane.f32.xlu1 %v679_v1 }
 0x556   : > { %v666_v16 = vpop.xlane.xlu0 %665 }
 0x557   : > { %v945_v17 = vtrunc.f32 %v666_v16 }
 0x559   : > { %v946_v19 = vcvt.f32.s32 %v945_v17 }
 0x55a   : > { %v669_v18 = vpop.xlane.xlu1 %668 }
 0x55b   : > { %v711_v30 = vsel %vm708_vm3, %v1332_v61, %v946_v19  ;;  %v947_v45 = vtrunc.f32 %v669_v18  ;;  %v660_v22 = vpop.xlane.xlu0 %659 }
 0x55c   : > { %720 = vst.msk [vmem:[%s1401_s23 + $0x10] sm:$0xff] %vm717_vm4, %v711_v30  ;;  %v941_v2 = vtrunc.f32 %v660_v22 }
 0x55d   : > { %v948_v23 = vcvt.f32.s32 %v947_v45 }
 0x55e   : > { %v942_v26 = vcvt.f32.s32 %v941_v2 }
 0x55f   : > { %v712_v57 = vsel %vm708_vm3, %v1342_v52, %v948_v23  ;;  %v672_v27 = vpop.xlane.xlu0 %671 }
 0x560   : > { %721 = vst.msk [vmem:[%s1401_s23 + $0x18] sm:$0xff] %vm717_vm4, %v712_v57  ;;  %v709_v63 = vsel %vm708_vm3, %v1346_v6, %v942_v26  ;;  %v949_v61 = vtrunc.f32 %v672_v27  ;;  %v663_v32 = vpop.xlane.xlu1 %662 }
 0x561   : > { %718 = vst.msk [vmem:[%s1401_s23] sm:$0xff] %vm717_vm4, %v709_v63  ;;  %v943_v10 = vtrunc.f32 %v663_v32 }
 0x562   : > { %v950_v52 = vcvt.f32.s32 %v949_v61 }
 0x563   : > { %v944_v24 = vcvt.f32.s32 %v943_v10 }
 0x564   : > { %v713_v6 = vsel %vm708_vm3, %v1356_v60, %v950_v52  ;;  %v675_v20 = vpop.xlane.xlu1 %674  ;;  %v678_v39 = vpop.xlane.xlu0 %677  ;;  %v697_v60 = vsel %vm690_vm12, %v906_v31, %v922_v36 }
 0x565   : > { %722 = vst.msk [vmem:[%s1401_s23 + $0x20] sm:$0xff] %vm717_vm4, %v713_v6  ;;  %v710_v21 = vsel %vm708_vm3, %v1360_v37, %v944_v24  ;;  %v951_v7 = vtrunc.f32 %v675_v20  ;;  %v953_v40 = vtrunc.f32 %v678_v39  ;;  %v706_v44 = vsel %vm699_vm15, %v697_v60, %v938_v38 }
 0x566   : > { %719 = vst.msk [vmem:[%s1401_s23 + $0x8] sm:$0xff] %vm717_vm4, %v710_v21 }
 0x567   : > { %v952_v4 = vcvt.f32.s32 %v951_v7  ;;  %v954_v42 = vcvt.f32.s32 %v953_v40 }
 0x568   : > { %v681_v43 = vpop.xlane.xlu1 %680 }
 0x569   : > { %v714_v37 = vsel %vm708_vm3, %v1375_v41, %v952_v4  ;;  %v955_v46 = vtrunc.f32 %v681_v43  ;;  %v715_v33 = vsel %vm708_vm3, %v706_v44, %v954_v42 }
 0x56a   : > { %723 = vst.msk [vmem:[%s1401_s23 + $0x28] sm:$0xff] %vm717_vm4, %v714_v37  ;;  %724 = vst.msk [vmem:[%s1401_s23 + $0x30] sm:$0xff] %vm717_vm4, %v715_v33 }
 0x56b   : > { %v956_v48 = vcvt.f32.s32 %v955_v46 }
 0x56d   : > { %v716_v49 = vsel %vm708_vm3, %v707_v8, %v956_v48 }
 0x56e   : > { %725 = vst.msk [vmem:[%s1401_s23 + $0x38] sm:$0xff] %vm717_vm4, %v716_v49 }
 0x56f PF: > { %s12_s11 = sadd.s32 1, %s1011_s11   ;;  %s1455_s9 = smov %s1007_s10 }
 0x570   : > { %p9_p5 = scmp.ge.s32.totalorder %s12_s11, 4   ;;  %s1456_s10 = smov %s1458_s12 }
 0x572   :  { %11 = sbr.rel (!%p9_p5) target bundleno = 2 (0x2), region = 61 }

// kernel: enet_gnn_forward.7
= control target key start
LH: loop header
LB: loop body
LE: loop exit
PB: predicated region body
PF: predicated region fallthrough
CT: control target
= control target key end

     0   :  { %s919_s13 = smov 0   ;;  %s921_s14 = smov 0   ;;  %s995_s0 = inlined_call_operand.vmem [shape: f32[2,1,64], index: 0, kind: input, shape index: {}]   ;;  %s996_s1 = inlined_call_operand.vmem [shape: f32[64,2], index: 1, kind: input, shape index: {}]   ;;  %s997_s2 = inlined_call_operand.vmem [shape: f32[1,2], index: 2, kind: input, shape index: {}]   ;;  %s998_s3 = inlined_call_operand.vmem [shape: f32[2,128], index: 3, kind: input, shape index: {}]   ;;  %s999_s4 = inlined_call_operand.vmem [shape: f32[1,128], index: 4, kind: input, shape index: {}]   ;;  %s1000_s5 = inlined_call_operand.vmem [shape: f32[2,16,128], index: 5, kind: input, shape index: {}]   ;;  %s1001_s6 = inlined_call_operand.vmem [shape: f32[2,16,128], index: 6, kind: input, shape index: {}]   ;;  %s1002_s7 = inlined_call_operand.<no memory space> [shape: f32[1,1], index: 7, kind: input, shape index: {}]   ;;  %s1003_s8 = inlined_call_operand.<no memory space> [shape: f32[1,1], index: 8, kind: input, shape index: {}]   ;;  %s1004_s9 = inlined_call_operand.vmem [shape: f32[2,16,128], index: 9, kind: output, shape index: {}]  }
   0x1   :  { %14 = sst [smem:[#allocation3]] %s1002_s7  ;;  %s923_s15 = smov 0  }
   0x2   :  { %15 = sst [smem:[#allocation4]] %s1003_s8 }
   0x3 LB: > { %s33_s7 = sadd.s32 1, %s855_s14  ;;  %p756_p0 = scmp.ge.s32.totalorder %s859_s15, 1  ;;  %s859_s15 = sphi %s923_s15, %s21_s15   ;;  %s855_s14 = sphi %s921_s14, %s1006_s14   ;;  %s851_s13 = sphi %s919_s13, %s1005_s13  }
   0x4   : > { %p35_p1 = scmp.ge.s32.totalorder %s33_s7, 2  ;;  %p335_p2 = scmp.lt.s32.totalorder %s859_s15, 3 }
   0x6   : > { %s1008_s7 = smov (%p35_p1, %s33_s7), 0  ;;  %p336_p3 = pnand %p756_p0, %p335_p2 }
   0x7   : > { %p391_p4 = scmp.lt.s32.totalorder (!%p336_p3), %s851_s13, 1  ;;  %s624_s22 = sld [smem:[#allocation3]] (!%p336_p3) }
   0x8   : > { %339 = sbr.rel (%p336_p3) target bundleno = 476 (0x1dc), region = 56  ;;  %s625_s23 = sld [smem:[#allocation4]] (!%p336_p3) }
   0xd   : > { %v436_v0 = vld [vmem:[%s996_s1 + $0x38] sm:$0xff]  ;;  %v861_v1 = vmov 0.0   ;;  %v435_v2 = vld [vmem:[%s996_s1 + $0x30] sm:$0xff]  ;;  %vm862_vm0 = vmmov 0   ;;  %v434_v3 = vld [vmem:[%s996_s1 + $0x28] sm:$0xff]  ;;  %s1010_s13 = smov (!%p391_p4, %s851_s13), 1  ;;  %v606_v24 = vlaneseq  ;;  %v626_v38 = vstv %s624_s22 }
   0xe   : > { %783 = vmatprep.subr.mxu0 %v861_v1  ;;  %799 = vmatprep.mubr.msk.f32.mxu0 %vm862_vm0, %v861_v1  ;;  %v433_v4 = vld [vmem:[%s996_s1 + $0x20] sm:$0xff]  ;;  %v432_v5 = vld [vmem:[%s996_s1 + $0x18] sm:$0xff]  ;;  %v431_v6 = vld [vmem:[%s996_s1 + $0x10] sm:$0xff]  ;;  %s393_s10 = scalar_lea.vmem %s995_s0, %s1010_s13  ;;  %vm438_vm1 = vcmask 523264   ;;  %vm521_vm2 = vcmask 1041408   ;;  %vm517_vm4 = vcmask 15360   ;;  %v629_v39 = vstv %s625_s23 }
   0xf   : > { %784 = vmatpush3.msra.mxu0 %v436_v0  ;;  %802 = vmatprep.subr.mxu1 %v861_v1  ;;  %v430_v7 = vld [vmem:[%s996_s1 + $0x8] sm:$0xff]  ;;  %v429_v8 = vld [vmem:[%s996_s1] sm:$0xff]  ;;  %v607_v26 = vshrl.u32 %v606_v24, 7  ;;  %s769_s21 = sshll.u32 %s1010_s13, 4 }
  0x10   : > { %785 = vmatprep.subr.mxu0 %v861_v1  ;;  %804 = vmatprep.mubr.msk.f32.mxu1 %vm862_vm0, %v861_v1  ;;  %v428_v9 = vld [vmem:[%s393_s10] sm:$0x1]  ;;  %s402_s26 = scalar_lea.vmem %s1000_s5, %s769_s21  ;;  %s412_s29 = scalar_lea.vmem %s1001_s6, %s769_s21 }
  0x11   : > { %786 = vmatpush3.msra.mxu0 %v435_v2  ;;  %v515_v10 = vld [vmem:[%s998_s3] sm:$0x3]  ;;  %v608_v27 = vsub.s32 0, %v607_v26  ;;  %v604_v29 = vld [vmem:[%s402_s26 + $0x8] sm:$0xff]  ;;  %s422_s10 = scalar_lea.vmem %s1004_s9, %s769_s21 }
  0x12   : > { %787 = vmatprep.subr.mxu0 %v861_v1  ;;  %803 = vmatpush3.msk.msra.mxu1 %vm521_vm2, %v515_v10  ;;  %v437_v11 = vld [vmem:[%s997_s2] sm:$0x1]  ;;  %v615_v34 = vld [vmem:[%s412_s29 + $0x8] sm:$0xff] }
  0x13   : > { %788 = vmatpush3.msra.mxu0 %v434_v3  ;;  %v516_v17 = vld [vmem:[%s999_s4] sm:$0x1] }
  0x14   : > { %789 = vmatprep.subr.mxu0 %v861_v1  ;;  %v603_v28 = vld [vmem:[%s402_s26] sm:$0xff] }
  0x15   : > { %790 = vmatpush3.msra.mxu0 %v433_v4  ;;  %v614_v33 = vld [vmem:[%s412_s29] sm:$0xff] }
  0x16   : > { %791 = vmatprep.subr.mxu0 %v861_v1 }
  0x17   : > { %792 = vmatpush3.msra.mxu0 %v432_v5 }
  0x18   : > { %793 = vmatprep.subr.mxu0 %v861_v1 }
  0x19   : > { %794 = vmatpush3.msra.mxu0 %v431_v6 }
  0x1a   : > { %795 = vmatprep.subr.mxu0 %v861_v1 }
  0x1b   : > { %796 = vmatpush3.msra.mxu0 %v430_v7 }
  0x1c   : > { %797 = vmatprep.subr.mxu0 %v861_v1 }
  0x1d   : > { %798 = vmatpush3.msra.mxu0 %v429_v8 }
  0x1e   : > { %800 = vmatmul.mubr.msk.f32.vlgmr.msra.gmra.mxu0 %vm438_vm1, %v428_v9 }
  0xde   : > { %v508_v12 = vpop.f32.mrf.mxu0 }
  0xdf   : > { %v509_v13 = vadd.f32 %v508_v12, %v437_v11 }
  0xe0   : > { %v801_v14 = vpop.f32.mrf.mxu0 }
  0xe1   : > { %vm512_vm3 = vcmp.ge.f32.partialorder %v509_v13, 0.0  ;;  %v513_v15 = vmul.f32 0.01, %v509_v13 }
  0xe3   : > { %v514_v16 = vsel %vm512_vm3, %v509_v13, %v513_v15 }
  0xe4   : > { %805 = vmatmul.mubr.msk.f32.vlgmr.msra.gmra.mxu1 %vm517_vm4, %v514_v16 }
 0x1a4   : > { %v591_v18 = vpop.f32.mrf.mxu1 }
 0x1a5   : > { %v592_v19 = vadd.f32 %v591_v18, %v516_v17 }
 0x1a6   : > { %v806_v20 = vpop.f32.mrf.mxu1 }
 0x1a7   : > { %v766_v21 = vmul.f32 -1.442695, %v592_v19 }
 0x1a9   : > { %833 = vpow2.f32 %v766_v21 }
 0x1b6   : > { %v834_v22 = vpop.eup %833 }
 0x1b7   : > { %v598_v23 = vadd.f32 1.0, %v834_v22 }
 0x1b9   : > { %835 = vrcp.f32 %v598_v23 }
 0x1c6   : > { %v836_v25 = vpop.eup %835 }
 0x1c7   : > { %601 = vst [vmem:[#allocation2] sm:$0x1] %v836_v25 }
 0x1ce   : > { %v602_v30 = vld [vmem:[#allocation2] sm:$0x1] }
 0x1cf   : > { %v609_v31 = vrot.slane %v602_v30, %v608_v27  ;;  %v613_v32 = vsub.f32 1.0, %v602_v30 }
 0x1d1   : > { %v611_v35 = vmul.f32 %v609_v31, %v603_v28  ;;  %v612_v36 = vmul.f32 %v609_v31, %v604_v29  ;;  %v620_v37 = vrot.slane %v613_v32, %v608_v27 }
 0x1d3   : > { %v622_v40 = vmul.f32 %v620_v37, %v614_v33  ;;  %v623_v41 = vmul.f32 %v620_v37, %v615_v34  ;;  %v627_v42 = vmul.f32 %v626_v38, %v611_v35  ;;  %v628_v43 = vmul.f32 %v626_v38, %v612_v36 }
 0x1d5   : > { %v630_v44 = vmul.f32 %v629_v39, %v622_v40  ;;  %v631_v45 = vmul.f32 %v629_v39, %v623_v41 }
 0x1d7   : > { %v632_v46 = vadd.f32 %v630_v44, %v627_v42  ;;  %v633_v47 = vadd.f32 %v631_v45, %v628_v43 }
 0x1d9   : > { %v634_v48 = vmax.f32 %v632_v46, 0.0  ;;  %v635_v49 = vmax.f32 %v633_v47, 0.0 }
 0x1db   : > { %636 = vst [vmem:[%s422_s10] sm:$0xff] %v634_v48  ;;  %637 = vst [vmem:[%s422_s10 + $0x8] sm:$0xff] %v635_v49 }
 0x1dc PF: > { %s21_s15 = sadd.s32 1, %s859_s15   ;;  %s1005_s13 = smov %s855_s14 }
 0x1dd   : > { %p18_p5 = scmp.ge.s32.totalorder %s21_s15, 4   ;;  %s1006_s14 = smov %s1008_s7 }
 0x1df   :  { %20 = sbr.rel (!%p18_p5) target bundleno = 3 (0x3), region = 96 }

// kernel: enet_gnn_forward.6
= control target key start
LH: loop header
LB: loop body
LE: loop exit
PB: predicated region body
PF: predicated region fallthrough
CT: control target
= control target key end

     0   :  { %s1041_s12 = smov 0   ;;  %s1043_s13 = smov 0   ;;  %s1264_s0 = inlined_call_operand.vmem [shape: f32[512,64], index: 0, kind: input, shape index: {}]   ;;  %s1265_s1 = inlined_call_operand.vmem [shape: f32[64,64], index: 1, kind: input, shape index: {}]   ;;  %s1266_s2 = inlined_call_operand.vmem [shape: f32[1,64], index: 2, kind: input, shape index: {}]   ;;  %s1267_s3 = inlined_call_operand.vmem [shape: f32[2,1,64], index: 3, kind: output, shape index: {}]  }
   0x1   :  { %s1045_s14 = smov 0  }
   0x2 LB: > { %s25_s15 = sadd.s32 1, %s1013_s13  ;;  %p792_p0 = scmp.ge.s32.totalorder %s1017_s14, 1  ;;  %s1017_s14 = sphi %s1045_s14, %s13_s14   ;;  %s1013_s13 = sphi %s1043_s13, %s1269_s13   ;;  %s1009_s12 = sphi %s1041_s12, %s1268_s12  }
   0x3   : > { %p27_p1 = scmp.ge.s32.totalorder %s25_s15, 2  ;;  %p154_p2 = scmp.lt.s32.totalorder %s1017_s14, 3 }
   0x5   : > { %s1271_s15 = smov (%p27_p1, %s25_s15), 0  ;;  %p155_p3 = pnand %p792_p0, %p154_p2 }
   0x6   : > { %s793_s20 = sshll.u32 (!%p155_p3), %s1009_s12, 5  ;;  %p185_p5 = scmp.lt.s32.totalorder (!%p155_p3), %s1009_s12, 1 }
   0x7   : > { %158 = sbr.rel (%p155_p3) target bundleno = 519 (0x207), region = 32  ;;  %p179_p4 = scmp.lt.s32.totalorder (!%p155_p3), %s793_s20, 63 }
   0xc   : > { %v233_v0 = vld [vmem:[%s1265_s1 + $0x38] sm:$0xff]  ;;  %v232_v1 = vld [vmem:[%s1265_s1 + $0x30] sm:$0xff]  ;;  %v231_v2 = vld [vmem:[%s1265_s1 + $0x28] sm:$0xff]  ;;  %s1273_s20 = smov (!%p179_p4, %s793_s20), 63  ;;  %vm241_vm0 = vcmask 523264   ;;  %v1019_v40 = vmov 1.0  }
   0xd   : > { %905 = vmatprep.subr.mxu0 %v233_v0  ;;  %v230_v3 = vld [vmem:[%s1265_s1 + $0x20] sm:$0xff]  ;;  %s794_s25 = sshll.u32 %s1273_s20, 3  ;;  %v229_v4 = vld [vmem:[%s1265_s1 + $0x18] sm:$0xff]  ;;  %v228_v6 = vld [vmem:[%s1265_s1 + $0x10] sm:$0xff]  ;;  %724 = vmatprep.mubr.f32.mxu1 %v1019_v40  ;;  %s1275_s12 = smov (!%p185_p5, %s1009_s12), 1 }
   0xe   : > { %906 = vmatpush3.msra.mxu0 %v233_v0  ;;  %s1080_s30 = scalar_lea.vmem %s1264_s0, %s794_s25  ;;  %v227_v7 = vld [vmem:[%s1265_s1 + $0x8] sm:$0xff]  ;;  %v226_v8 = vld [vmem:[%s1265_s1] sm:$0xff]  ;;  %s187_s18 = scalar_lea.vmem %s1267_s3, %s1275_s12 }
   0xf   : > { %907 = vmatprep.subr.mxu0 %v232_v1  ;;  %v194_v5 = vld [vmem:[%s1080_s30] sm:$0xff]  ;;  %v195_v9 = vld [vmem:[%s1080_s30 + $0x8] sm:$0xff]  ;;  %v196_v10 = vld [vmem:[%s1080_s30 + $0x10] sm:$0xff] }
  0x10   : > { %908 = vmatpush3.msra.mxu0 %v232_v1  ;;  %921 = vmatprep.mubr.msk.f32.mxu0 %vm241_vm0, %v194_v5  ;;  %v197_v11 = vld [vmem:[%s1080_s30 + $0x18] sm:$0xff]  ;;  %v198_v12 = vld [vmem:[%s1080_s30 + $0x20] sm:$0xff]  ;;  %v199_v13 = vld [vmem:[%s1080_s30 + $0x28] sm:$0xff] }
  0x11   : > { %909 = vmatprep.subr.mxu0 %v231_v2  ;;  %v200_v14 = vld [vmem:[%s1080_s30 + $0x30] sm:$0xff]  ;;  %v201_v15 = vld [vmem:[%s1080_s30 + $0x38] sm:$0xff]  ;;  %v202_v16 = vld [vmem:[%s1080_s30 + $0x40] sm:$0xff] }
  0x12   : > { %910 = vmatpush3.msra.mxu0 %v231_v2  ;;  %v203_v17 = vld [vmem:[%s1080_s30 + $0x48] sm:$0xff]  ;;  %v204_v18 = vld [vmem:[%s1080_s30 + $0x50] sm:$0xff]  ;;  %v205_v19 = vld [vmem:[%s1080_s30 + $0x58] sm:$0xff] }
  0x13   : > { %911 = vmatprep.subr.mxu0 %v230_v3  ;;  %v206_v20 = vld [vmem:[%s1080_s30 + $0x60] sm:$0xff]  ;;  %v207_v21 = vld [vmem:[%s1080_s30 + $0x68] sm:$0xff]  ;;  %v208_v22 = vld [vmem:[%s1080_s30 + $0x70] sm:$0xff] }
  0x14   : > { %912 = vmatpush3.msra.mxu0 %v230_v3  ;;  %v209_v23 = vld [vmem:[%s1080_s30 + $0x78] sm:$0xff]  ;;  %v210_v24 = vld [vmem:[%s1080_s30 + $0x80] sm:$0xff]  ;;  %v211_v25 = vld [vmem:[%s1080_s30 + $0x88] sm:$0xff] }
  0x15   : > { %913 = vmatprep.subr.mxu0 %v229_v4  ;;  %v212_v26 = vld [vmem:[%s1080_s30 + $0x90] sm:$0xff]  ;;  %v213_v27 = vld [vmem:[%s1080_s30 + $0x98] sm:$0xff]  ;;  %v214_v28 = vld [vmem:[%s1080_s30 + $0xa0] sm:$0xff] }
  0x16   : > { %914 = vmatpush3.msra.mxu0 %v229_v4  ;;  %v215_v29 = vld [vmem:[%s1080_s30 + $0xa8] sm:$0xff]  ;;  %v216_v30 = vld [vmem:[%s1080_s30 + $0xb0] sm:$0xff]  ;;  %v217_v31 = vld [vmem:[%s1080_s30 + $0xb8] sm:$0xff] }
  0x17   : > { %915 = vmatprep.subr.mxu0 %v228_v6  ;;  %v218_v32 = vld [vmem:[%s1080_s30 + $0xc0] sm:$0xff]  ;;  %v219_v33 = vld [vmem:[%s1080_s30 + $0xc8] sm:$0xff]  ;;  %v220_v34 = vld [vmem:[%s1080_s30 + $0xd0] sm:$0xff] }
  0x18   : > { %916 = vmatpush3.msra.mxu0 %v228_v6  ;;  %v221_v35 = vld [vmem:[%s1080_s30 + $0xd8] sm:$0xff]  ;;  %v222_v36 = vld [vmem:[%s1080_s30 + $0xe0] sm:$0xff]  ;;  %v223_v37 = vld [vmem:[%s1080_s30 + $0xe8] sm:$0xff] }
  0x19   : > { %917 = vmatprep.subr.mxu0 %v227_v7  ;;  %v224_v38 = vld [vmem:[%s1080_s30 + $0xf0] sm:$0xff]  ;;  %v225_v39 = vld [vmem:[%s1080_s30 + $0xf8] sm:$0xff]  ;;  %v1195_v6 = vld [vmem:[%s1266_s2] ss:$0 sm:$0xff] }
  0x1a   : > { %918 = vmatpush3.msra.mxu0 %v227_v7 }
  0x1b   : > { %919 = vmatprep.subr.mxu0 %v226_v8 }
  0x1c   : > { %920 = vmatpush3.msra.mxu0 %v226_v8 }
  0x1d   : > { %922 = vmatmul.mubr.msk.f32.vlgmr.msra.gmra.mxu0 %vm241_vm0, %v195_v9 }
  0x1e   : > { %924 = vmatprep.mubr.msk.f32.mxu0 %vm241_vm0, %v196_v10 }
  0x21   : > { %925 = vmatmul.mubr.msk.f32.gmra.mxu0 %vm241_vm0, %v197_v11 }
  0x22   : > { %927 = vmatprep.mubr.msk.f32.mxu0 %vm241_vm0, %v198_v12 }
  0x25   : > { %928 = vmatmul.mubr.msk.f32.gmra.mxu0 %vm241_vm0, %v199_v13 }
  0x26   : > { %930 = vmatprep.mubr.msk.f32.mxu0 %vm241_vm0, %v200_v14 }
  0x29   : > { %931 = vmatmul.mubr.msk.f32.gmra.mxu0 %vm241_vm0, %v201_v15 }
  0x2a   : > { %933 = vmatprep.mubr.msk.f32.mxu0 %vm241_vm0, %v202_v16 }
  0x2d   : > { %934 = vmatmul.mubr.msk.f32.gmra.mxu0 %vm241_vm0, %v203_v17 }
  0x2e   : > { %936 = vmatprep.mubr.msk.f32.mxu0 %vm241_vm0, %v204_v18 }
  0x31   : > { %937 = vmatmul.mubr.msk.f32.gmra.mxu0 %vm241_vm0, %v205_v19 }
  0x32   : > { %939 = vmatprep.mubr.msk.f32.mxu0 %vm241_vm0, %v206_v20 }
  0x35   : > { %940 = vmatmul.mubr.msk.f32.gmra.mxu0 %vm241_vm0, %v207_v21 }
  0x36   : > { %942 = vmatprep.mubr.msk.f32.mxu0 %vm241_vm0, %v208_v22 }
  0x39   : > { %943 = vmatmul.mubr.msk.f32.gmra.mxu0 %vm241_vm0, %v209_v23 }
  0x3a   : > { %945 = vmatprep.mubr.msk.f32.mxu0 %vm241_vm0, %v210_v24 }
  0x3d   : > { %946 = vmatmul.mubr.msk.f32.gmra.mxu0 %vm241_vm0, %v211_v25 }
  0x3e   : > { %948 = vmatprep.mubr.msk.f32.mxu0 %vm241_vm0, %v212_v26 }
  0x41   : > { %949 = vmatmul.mubr.msk.f32.gmra.mxu0 %vm241_vm0, %v213_v27 }
  0x42   : > { %951 = vmatprep.mubr.msk.f32.mxu0 %vm241_vm0, %v214_v28 }
  0x45   : > { %952 = vmatmul.mubr.msk.f32.gmra.mxu0 %vm241_vm0, %v215_v29 }
  0x46   : > { %954 = vmatprep.mubr.msk.f32.mxu0 %vm241_vm0, %v216_v30 }
  0x49   : > { %955 = vmatmul.mubr.msk.f32.gmra.mxu0 %vm241_vm0, %v217_v31 }
  0x4a   : > { %957 = vmatprep.mubr.msk.f32.mxu0 %vm241_vm0, %v218_v32 }
  0x4d   : > { %958 = vmatmul.mubr.msk.f32.gmra.mxu0 %vm241_vm0, %v219_v33 }
  0x4e   : > { %960 = vmatprep.mubr.msk.f32.mxu0 %vm241_vm0, %v220_v34 }
  0x51   : > { %961 = vmatmul.mubr.msk.f32.gmra.mxu0 %vm241_vm0, %v221_v35 }
  0x52   : > { %963 = vmatprep.mubr.msk.f32.mxu0 %vm241_vm0, %v222_v36 }
  0x55   : > { %964 = vmatmul.mubr.msk.f32.gmra.mxu0 %vm241_vm0, %v223_v37 }
  0x56   : > { %966 = vmatprep.mubr.msk.f32.mxu0 %vm241_vm0, %v224_v38 }
  0x59   : > { %967 = vmatmul.mubr.msk.f32.gmra.mxu0 %vm241_vm0, %v225_v39 }
  0xdd   : > { %v1156_v41 = vpop.f32.mrf.mxu0 }
  0xdf   : > { %v1158_v42 = vpop.f32.mrf.mxu0 }
  0xe1   : > { %v1160_v43 = vpop.f32.mrf.mxu0 }
  0xe3   : > { %v1162_v44 = vpop.f32.mrf.mxu0 }
  0xe5   : > { %v1164_v45 = vpop.f32.mrf.mxu0 }
  0xe7   : > { %v1166_v46 = vpop.f32.mrf.mxu0 }
  0xe9   : > { %v1168_v47 = vpop.f32.mrf.mxu0 }
  0xeb   : > { %v1170_v48 = vpop.f32.mrf.mxu0 }
  0xed   : > { %v1172_v49 = vpop.f32.mrf.mxu0 }
  0xee   : > { %v450_v37 = vadd.f32 %v1172_v49, %v1195_v6 }
  0xef   : > { %v1174_v50 = vpop.f32.mrf.mxu0 }
  0xf0   : > { %vm572_vm14 = vcmp.ge.f32.partialorder %v450_v37, 0.0 }
  0xf1   : > { %v938_v51 = vpop.f32.mrf.mxu0 }
  0xf2   : > { %v460_v25 = vadd.f32 %v938_v51, %v1195_v6 }
  0xf3   : > { %v454_v52 = vpop.f32.mrf.mxu0 }
  0xf4   : > { %v455_v31 = vadd.f32 %v1195_v6, %v454_v52  ;;  %v606_v38 = vmul.f32 0.01, %v460_v25  ;;  %vm574_vm10 = vcmp.ge.f32.partialorder %v460_v25, 0.0 }
  0xf5   : > { %v941_v53 = vpop.f32.mrf.mxu0 }
  0xf6   : > { %v470_v13 = vadd.f32 %v941_v53, %v1195_v6  ;;  %vm573_vm12 = vcmp.ge.f32.partialorder %v455_v31, 0.0 }
  0xf7   : > { %v464_v54 = vpop.f32.mrf.mxu0 }
  0xf8   : > { %v465_v19 = vadd.f32 %v1195_v6, %v464_v54  ;;  %v608_v26 = vmul.f32 0.01, %v470_v13  ;;  %vm576_vm6 = vcmp.ge.f32.partialorder %v470_v13, 0.0  ;;  %v445_v54 = vadd.f32 %v1195_v6, %v1174_v50 }
  0xf9   : > { %v944_v55 = vpop.f32.mrf.mxu0 }
  0xfa   : > { %v480_v7 = vadd.f32 %v944_v55, %v1195_v6  ;;  %v607_v32 = vmul.f32 0.01, %v465_v19  ;;  %vm575_vm8 = vcmp.ge.f32.partialorder %v465_v19, 0.0  ;;  %v640_v39 = vsel %vm576_vm6, %v470_v13, %v608_v26 }
  0xfb   : > { %v474_v56 = vpop.f32.mrf.mxu0  ;;  %v605_v55 = vmul.f32 0.01, %v455_v31  ;;  %vm571_vm0 = vcmp.ge.f32.partialorder %v445_v54, 0.0 }
  0xfc   : > { %v475_v9 = vadd.f32 %v1195_v6, %v474_v56  ;;  %vm578_vm1 = vcmp.ge.f32.partialorder %v480_v7, 0.0  ;;  %v610_v15 = vmul.f32 0.01, %v480_v7  ;;  %v639_v56 = vsel %vm575_vm8, %v465_v19, %v607_v32 }
  0xfd   : > { %v1176_v57 = vpop.f32.mrf.mxu0 }
  0xfe   : > { %v609_v20 = vmul.f32 0.01, %v475_v9  ;;  %vm577_vm3 = vcmp.ge.f32.partialorder %v475_v9, 0.0  ;;  %v642_v27 = vsel %vm578_vm1, %v480_v7, %v610_v15 }
  0xff   : > { %v1178_v58 = vpop.f32.mrf.mxu0 }
 0x100   : > { %v641_v33 = vsel %vm577_vm3, %v475_v9, %v609_v20  ;;  %v603_v9 = vmul.f32 0.01, %v445_v54 }
 0x101   : > { %v1180_v59 = vpop.f32.mrf.mxu0 }
 0x103   : > { %v1182_v60 = vpop.f32.mrf.mxu0 }
 0x105   : > { %v1184_v61 = vpop.f32.mrf.mxu0 }
 0x107   : > { %v1186_v62 = vpop.f32.mrf.mxu0 }
 0x109   : > { %v1188_v63 = vpop.f32.mrf.mxu0 }
 0x10a   : > { %v520_v49 = vadd.f32 %v1188_v63, %v1195_v6  ;;  %v435_v63 = vadd.f32 %v1195_v6, %v1170_v48  ;;  %v505_v48 = vadd.f32 %v1195_v6, %v1186_v62  ;;  %v420_v62 = vadd.f32 %v1160_v43, %v1195_v6 }
 0x10b   : > { %v1190_v0 = vpop.f32.mrf.mxu0  ;;  %v490_v43 = vadd.f32 %v1176_v57, %v1195_v6  ;;  %v405_v57 = vadd.f32 %v1195_v6, %v1158_v42 }
 0x10c   : > { %v515_v50 = vadd.f32 %v1195_v6, %v1190_v0  ;;  %v430_v0 = vadd.f32 %v1164_v45, %v1195_v6  ;;  %vm586_vm1 = vcmp.ge.f32.partialorder %v520_v49, 0.0  ;;  %v500_v45 = vadd.f32 %v1180_v59, %v1195_v6 }
 0x10d   : > { %v959_v1 = vpop.f32.mrf.mxu0  ;;  %v415_v59 = vadd.f32 %v1195_v6, %v1162_v44  ;;  %v485_v44 = vadd.f32 %v1195_v6, %v1178_v58 }
 0x10e   : > { %v530_v34 = vadd.f32 %v959_v1, %v1195_v6  ;;  %v617_v15 = vmul.f32 0.01, %v515_v50  ;;  %vm585_vm3 = vcmp.ge.f32.partialorder %v515_v50, 0.0  ;;  %vm568_vm6 = vcmp.ge.f32.partialorder %v430_v0, 0.0 }
 0x10f   : > { %v524_v2 = vpop.f32.mrf.mxu0  ;;  %v611_v58 = vmul.f32 0.01, %v485_v44 }
 0x110   : > { %v525_v51 = vadd.f32 %v1195_v6, %v524_v2  ;;  %v620_v1 = vmul.f32 0.01, %v530_v34  ;;  %v440_v2 = vadd.f32 %v1168_v47, %v1195_v6  ;;  %vm588_vm13 = vcmp.ge.f32.partialorder %v530_v34, 0.0 }
 0x111   : > { %v962_v3 = vpop.f32.mrf.mxu0  ;;  %v510_v47 = vadd.f32 %v1184_v61, %v1195_v6  ;;  %v425_v61 = vadd.f32 %v1195_v6, %v1166_v46  ;;  %v495_v46 = vadd.f32 %v1195_v6, %v1182_v60  ;;  %v410_v60 = vadd.f32 %v1156_v41, %v1195_v6 }
 0x112   : > { %v540_v21 = vadd.f32 %v962_v3, %v1195_v6  ;;  %v619_v7 = vmul.f32 0.01, %v525_v51  ;;  %vm587_vm15 = vcmp.ge.f32.partialorder %v525_v51, 0.0  ;;  %v602_v13 = vmul.f32 0.01, %v440_v2 }
 0x113   : > { %v534_v4 = vpop.f32.mrf.mxu0  ;;  %v616_v19 = vmul.f32 0.01, %v510_v47  ;;  %vm567_vm8 = vcmp.ge.f32.partialorder %v425_v61, 0.0 }
 0x114   : > { %v535_v28 = vadd.f32 %v1195_v6, %v534_v4  ;;  %v622_v35 = vmul.f32 0.01, %v540_v21  ;;  %vm590_vm9 = vcmp.ge.f32.partialorder %v540_v21, 0.0  ;;  %v604_v4 = vmul.f32 0.01, %v450_v37 }
 0x115   : > { %v965_v5 = vpop.f32.mrf.mxu0 }
 0x116   : > { %v550_v11 = vadd.f32 %v965_v5, %v1195_v6  ;;  %v621_v52 = vmul.f32 0.01, %v535_v28  ;;  %vm589_vm11 = vcmp.ge.f32.partialorder %v535_v28, 0.0  ;;  %v654_v3 = vsel %vm590_vm9, %v540_v21, %v622_v35 }
 0x117   : > { %v544_v8 = vpop.f32.mrf.mxu0  ;;  %v638_v5 = vsel %vm574_vm10, %v460_v25, %v606_v38  ;;  %v600_v21 = vmul.f32 0.01, %v430_v0  ;;  %v599_v25 = vmul.f32 0.01, %v425_v61  ;;  %vm582_vm9 = vcmp.ge.f32.partialorder %v500_v45, 0.0 }
 0x118   : > { %v545_v16 = vadd.f32 %v1195_v6, %v544_v8  ;;  %v624_v22 = vmul.f32 0.01, %v550_v11  ;;  %vm592_vm5 = vcmp.ge.f32.partialorder %v550_v11, 0.0  ;;  %v653_v8 = vsel %vm589_vm11, %v535_v28, %v621_v52 }
 0x119   : > { %v968_v10 = vpop.f32.mrf.mxu0  ;;  %vm566_vm10 = vcmp.ge.f32.partialorder %v420_v62, 0.0  ;;  %vm581_vm11 = vcmp.ge.f32.partialorder %v495_v46, 0.0  ;;  %v612_v35 = vmul.f32 0.01, %v490_v43 }
 0x11a   : > { %v560_v12 = vadd.f32 %v968_v10, %v1195_v6  ;;  %v623_v29 = vmul.f32 0.01, %v545_v16  ;;  %vm591_vm7 = vcmp.ge.f32.partialorder %v545_v16, 0.0  ;;  %v656_v36 = vsel %vm592_vm5, %v550_v11, %v624_v22 }
 0x11b   : > { %v554_v14 = vpop.f32.mrf.mxu0  ;;  %v637_v10 = vsel %vm573_vm12, %v455_v31, %v605_v55  ;;  %v618_v11 = vmul.f32 0.01, %v520_v49  ;;  %vm584_vm5 = vcmp.ge.f32.partialorder %v510_v47, 0.0  ;;  %v613_v31 = vmul.f32 0.01, %v495_v46 }
 0x11c   : > { %v555_v17 = vadd.f32 %v1195_v6, %v554_v14  ;;  %vm594_vm2 = vcmp.ge.f32.partialorder %v560_v12, 0.0  ;;  %v626_v18 = vmul.f32 0.01, %v560_v12  ;;  %v655_v53 = vsel %vm591_vm7, %v545_v16, %v623_v29 }
 0x11d   : > { %v636_v14 = vsel %vm572_vm14, %v450_v37, %v604_v4  ;;  %v651_v16 = vsel %vm587_vm15, %v525_v51, %v619_v7  ;;  %v650_v20 = vsel %vm586_vm1, %v520_v49, %v618_v11  ;;  %vm583_vm7 = vcmp.ge.f32.partialorder %v505_v48, 0.0 }
 0x11e   : > { %v625_v23 = vmul.f32 0.01, %v555_v17  ;;  %v658_v24 = vsel %vm594_vm2, %v560_v12, %v626_v18  ;;  %vm593_vm4 = vcmp.ge.f32.partialorder %v555_v17, 0.0  ;;  %v652_v12 = vsel %vm588_vm13, %v530_v34, %v620_v1 }
 0x11f   : > { %870 = vmatprep.subr.mxu1 %v658_v24  ;;  %vm570_vm2 = vcmp.ge.f32.partialorder %v440_v2, 0.0  ;;  %v635_v18 = vsel %vm571_vm0, %v445_v54, %v603_v9  ;;  %v649_v24 = vsel %vm585_vm3, %v515_v50, %v617_v15  ;;  %v648_v28 = vsel %vm584_vm5, %v510_v47, %v616_v19 }
 0x120   : > { %871 = vmatpush3.msra.mxu1 %v642_v27  ;;  %v657_v30 = vsel %vm593_vm4, %v555_v17, %v625_v23  ;;  %v601_v17 = vmul.f32 0.01, %v435_v63  ;;  %vm569_vm4 = vcmp.ge.f32.partialorder %v435_v63, 0.0  ;;  %v634_v22 = vsel %vm570_vm2, %v440_v2, %v602_v13 }
 0x121   : > { %872 = vmatprep.subr.mxu1 %v657_v30  ;;  %v615_v23 = vmul.f32 0.01, %v505_v48  ;;  %v614_v27 = vmul.f32 0.01, %v500_v45  ;;  %v598_v29 = vmul.f32 0.01, %v420_v62  ;;  %v632_v30 = vsel %vm568_vm6, %v430_v0, %v600_v21 }
 0x122   : > { %873 = vmatpush3.msra.mxu1 %v641_v33  ;;  %v633_v26 = vsel %vm569_vm4, %v435_v63, %v601_v17  ;;  %v597_v33 = vmul.f32 0.01, %v415_v59  ;;  %v631_v34 = vsel %vm567_vm8, %v425_v61, %v599_v25  ;;  %vm565_vm12 = vcmp.ge.f32.partialorder %v415_v59, 0.0 }
 0x123   : > { %874 = vmatprep.subr.mxu1 %v656_v36  ;;  %v647_v32 = vsel %vm583_vm7, %v505_v48, %v615_v23  ;;  %v646_v41 = vsel %vm582_vm9, %v500_v45, %v614_v27  ;;  %v596_v36 = vmul.f32 0.01, %v410_v60  ;;  %v630_v37 = vsel %vm566_vm10, %v420_v62, %v598_v29 }
 0x124   : > { %875 = vmatpush3.msra.mxu1 %v640_v39  ;;  %vm580_vm13 = vcmp.ge.f32.partialorder %v490_v43, 0.0  ;;  %v645_v38 = vsel %vm581_vm11, %v495_v46, %v613_v31  ;;  %vm564_vm14 = vcmp.ge.f32.partialorder %v410_v60, 0.0  ;;  %v595_v39 = vmul.f32 0.01, %v405_v57 }
 0x125   : > { %876 = vmatprep.subr.mxu1 %v655_v53  ;;  %v629_v42 = vsel %vm565_vm12, %v415_v59, %v597_v33  ;;  %vm579_vm15 = vcmp.ge.f32.partialorder %v485_v44, 0.0  ;;  %v644_v6 = vsel %vm580_vm13, %v490_v43, %v612_v35  ;;  %vm563_vm0 = vcmp.ge.f32.partialorder %v405_v57, 0.0 }
 0x126   : > { %877 = vmatpush3.msra.mxu1 %v639_v56  ;;  %v628_v51 = vsel %vm564_vm14, %v410_v60, %v596_v36  ;;  %v643_v52 = vsel %vm579_vm15, %v485_v44, %v611_v58  ;;  %v627_v53 = vsel %vm563_vm0, %v405_v57, %v595_v39  ;;  %vm192_vm1 = vcmask 516096  }
 0x127   : > { %878 = vmatprep.subr.mxu1 %v654_v3  ;;  %v1020_v54 = vmov 0.0  }
 0x128   : > { %879 = vmatpush3.msra.mxu1 %v638_v5  ;;  %193 = vst.msk [vmem:[%s187_s18] sm:$0x1] %vm192_vm1, %v1020_v54 }
 0x129   : > { %880 = vmatprep.subr.mxu1 %v653_v8 }
 0x12a   : > { %881 = vmatpush3.msra.mxu1 %v637_v10 }
 0x12b   : > { %882 = vmatprep.subr.mxu1 %v652_v12 }
 0x12c   : > { %883 = vmatpush3.msra.mxu1 %v636_v14 }
 0x12d   : > { %884 = vmatprep.subr.mxu1 %v651_v16 }
 0x12e   : > { %885 = vmatpush3.msra.mxu1 %v635_v18 }
 0x12f   : > { %886 = vmatprep.subr.mxu1 %v650_v20  ;;  %v659_v56 = vld [vmem:[%s187_s18] sm:$0x1] }
 0x130   : > { %887 = vmatpush3.msra.mxu1 %v634_v22 }
 0x131   : > { %888 = vmatprep.subr.mxu1 %v649_v24 }
 0x132   : > { %889 = vmatpush3.msra.mxu1 %v633_v26 }
 0x133   : > { %890 = vmatprep.subr.mxu1 %v648_v28 }
 0x134   : > { %891 = vmatpush3.msra.mxu1 %v632_v30 }
 0x135   : > { %892 = vmatprep.subr.mxu1 %v647_v32 }
 0x136   : > { %893 = vmatpush3.msra.mxu1 %v631_v34 }
 0x137   : > { %894 = vmatprep.subr.mxu1 %v646_v41 }
 0x138   : > { %895 = vmatpush3.msra.mxu1 %v630_v37 }
 0x139   : > { %896 = vmatprep.subr.mxu1 %v645_v38 }
 0x13a   : > { %897 = vmatpush3.msra.mxu1 %v629_v42 }
 0x13b   : > { %898 = vmatprep.subr.mxu1 %v644_v6 }
 0x13c   : > { %899 = vmatpush3.msra.mxu1 %v628_v51 }
 0x13d   : > { %900 = vmatprep.subr.mxu1 %v643_v52 }
 0x13e   : > { %901 = vmatpush3.msra.mxu1 %v627_v53 }
 0x13f   : > { %725 = vmatmul.mubr.f32.vlgmr.msra.gmra.mxu1 %v1019_v40 }
 0x1ff   : > { %v902_v55 = vpop.f32.mrf.mxu1 }
 0x201   : > { %v903_v49 = vpop.f32.mrf.mxu1 }
 0x202   : > { %v904_v1 = vadd.f32 %v903_v49, %v902_v55 }
 0x204   : > { %v730_v3 = vadd.f32 %v904_v1, %v659_v56 }
 0x206   : > { %732 = vst.msk [vmem:[%s187_s18] sm:$0x1] %vm192_vm1, %v730_v3 }
 0x207 PF: > { %s13_s14 = sadd.s32 1, %s1017_s14   ;;  %s1268_s12 = smov %s1013_s13 }
 0x208   : > { %p10_p6 = scmp.ge.s32.totalorder %s13_s14, 4   ;;  %s1269_s13 = smov %s1271_s15 }
 0x20a   :  { %12 = sbr.rel (!%p10_p6) target bundleno = 2 (0x2), region = 66 }

</bundles_post_ra>
